<compile_context>
chip_gen: v7x
topology: tpu7x:2x2x1
jax: 0.10.0
libtpu: 0.0.40
codegen_flags: <defaults>
</compile_context>

<pallas_src>
import functools

import numpy as np
import jax
import jax.numpy as jnp
from jax.experimental import pallas as pl
from jax.experimental.pallas import tpu as pltpu


# ----------------------------------------------------------------------------------
# Fused NTM kernel: hoisted h-only projections + serial C recurrence + FCN/activation
# epilogue, single lane-dense (8, 128) output slab.
#   h_ref : (N*O, H)  rows in batch-major order (row = n*O + o)
#   c_ref : (N, C1, C2)
# ----------------------------------------------------------------------------------
def _ntm_fused_kernel(h_ref, c_ref,
                      w_pre_ref, b_pre_ref,     # (H, C2+3H)=(32,128), (1,128)  [wk | whh]
                      wb_ref, bb_ref,           # (1, H), (1, 1)   beta projection (row vec)
                      w_ih_ref, b_ih_ref,       # (C2, 3H), (1, 3H)   GRU W_ih
                      w_ev_ref, b_ev_ref,       # (H, 2*C2), (1, 2*C2)   [we | wv]
                      w1_ref, b1_ref, w2_ref, b2_ref,   # FCN head
                      out_ref,                  # (8, 128) padded output slab
                      *, dims):
    de, dl, dp, dYs, dYa = dims
    N, C1, C2 = c_ref.shape
    NO, H = h_ref.shape
    O = NO // N
    ROWS, LANES = out_ref.shape
    eps = 1e-8

    h_flat = h_ref[...]                       # (N*O, H)
    C = c_ref[...]                            # (N, C1, C2) loaded ONCE, carried as a value

    # ---- hoisted: projections that depend only on h_prev, one 128-lane matmul -------
    # columns: [ k (C2) | gh_r (H) | gh_z (H) | gh_n (H) ]  -> exactly 128 lanes
    pre = jnp.dot(h_flat, w_pre_ref[...],
                  preferred_element_type=jnp.float32) + b_pre_ref[...]      # (N*O, 128)

    pre3 = pre.reshape(N, O, C2 + 3 * H)      # per-object slicing without strided rows
    h3 = h_flat.reshape(N, O, H)

    # ---- serial recurrence over objects: only C is carried (fully unrolled) ----------
    h_news = []
    for i in range(O):
        p_i = pre3[:, i, :]                   # (N, 128)
        k_i = p_i[:, :C2]                     # addressing key
        gh_r = p_i[:, C2:C2 + H]              # GRU hidden-gate pre-activations (r|z|n)
        gh_z = p_i[:, C2 + H:C2 + 2 * H]
        gh_n = p_i[:, C2 + 2 * H:C2 + 3 * H]
        h_i = h3[:, i, :]                     # (N, H)

        # beta = softplus(beta_pre) + 1  (algebraically equal to the torch expression);
        # tiny VPU multiply + lane reduce, kept out of the 128-lane matmul.
        bp = jnp.sum(h_i * wb_ref[...], axis=1, keepdims=True) + bb_ref[...]   # (N, 1)
        beta = jnp.maximum(bp, 0.0) + jnp.log1p(jnp.exp(-jnp.abs(bp))) + 1.0

        # content addressing: cosine similarity along dim_C2_2 (VPU mult + lane reduce)
        k_nm = jnp.sqrt(jnp.sum(k_i * k_i, axis=1, keepdims=True))             # (N, 1)
        dots = jnp.sum(k_i[:, None, :] * C, axis=2)                            # (N, C1)
        c_nm = jnp.sqrt(jnp.sum(C * C, axis=2))                                # (N, C1)
        # NOTE: clamps the product of norms (old torch CosineSimilarity behaviour).
        s = dots * pl.reciprocal(jnp.maximum(c_nm * k_nm, eps), approx=True)

        # attention weights: softmax over C2_1 of s * beta
        logits = s * beta
        logits = logits - jnp.max(logits, axis=1, keepdims=True)
        p = jnp.exp(logits)
        w = p * pl.reciprocal(jnp.sum(p, axis=1, keepdims=True), approx=True)  # (N, C1)

        # read vector r = w @ C  (VPU multiply + sublane reduce)
        r = jnp.sum(w[:, :, None] * C, axis=1)                                 # (N, C2)

        # GRUCell(r, h_i)  (PyTorch gate order: r | z | n)
        gi = jnp.dot(r, w_ih_ref[...],
                     preferred_element_type=jnp.float32) + b_ih_ref[...]       # (N, 3H)
        r_g = jax.nn.sigmoid(gi[:, :H] + gh_r)
        z_g = jax.nn.sigmoid(gi[:, H:2 * H] + gh_z)
        n_g = jnp.tanh(gi[:, 2 * H:] + r_g * gh_n)
        h_new = (1.0 - z_g) * n_g + z_g * h_i                                  # (N, H)

        # memory erase / write update (fused e|v projection of h_new)
        ev = jnp.dot(h_new, w_ev_ref[...],
                     preferred_element_type=jnp.float32) + b_ev_ref[...]       # (N, 2*C2)
        e = jax.nn.sigmoid(ev[:, :C2])
        v = ev[:, C2:]
        w3 = w[:, :, None]                                                     # (N, C1, 1)
        C = C * (1.0 - w3 * e[:, None, :]) + w3 * v[:, None, :]

        h_news.append(h_new)                  # kept as a value; no per-object store

    # ---- FCN head + activation epilogue on resident values, single output store ------
    h_cat = jnp.stack(h_news, axis=1).reshape(NO, H)                           # batch-major
    hid = jnp.maximum(jnp.dot(h_cat, w1_ref[...],
                              preferred_element_type=jnp.float32) + b1_ref[...], 0.0)
    a = jnp.dot(hid, w2_ref[...],
                preferred_element_type=jnp.float32) + b2_ref[...]              # (N*O, dim_y)

    a_e = a[:, :de]
    a_l = a[:, de:de + dl]
    a_p = a[:, de + dl:de + dl + dp]
    a_s = a[:, de + dl + dp:de + dl + dp + dYs]
    a_a = a[:, de + dl + dp + dYs:de + dl + dp + dYs + dYa]

    y_e = jnp.abs(jnp.tanh(a_e))
    y_p = jnp.tanh(a_p)
    # TODO(synk): smd.STGumbelSigmoid is stochastic at train time; the deterministic
    # hard threshold (sigmoid(a_s) > 0.5  <=>  a_s > 0) is the eval behaviour.
    Y_s = (a_s > 0.0).astype(jnp.float32)
    Y_a = jax.nn.sigmoid(a_a)

    pieces = [h_cat, y_e, a_l, y_p, Y_s, Y_a]
    used = H + de + dl + dp + dYs + dYa
    if used < LANES:
        pieces.append(jnp.zeros((NO, LANES - used), jnp.float32))
    slab = jnp.concatenate(pieces, axis=1)                                     # (N*O, 128)
    if NO < ROWS:
        slab = jnp.concatenate([slab, jnp.zeros((ROWS - NO, LANES), jnp.float32)], axis=0)
    out_ref[...] = slab                       # ONE unmasked full-vreg store


# ----------------------------------------------------------------------------------
# Parameter packing (done once, outside the jitted forward)
# ----------------------------------------------------------------------------------
def pack_params(params):
    wk, bk, wb, bb, wih, bih, whh, bhh, we, be, wv, bv = params['cell']
    w1, b1, w2, b2 = params['fcn']
    # columns: [ k (C2) | gh_r (H) | gh_z (H) | gh_n (H) ]  -> exactly 128 output lanes
    w_pre = jnp.concatenate([wk, whh], axis=1)
    b_pre = jnp.concatenate([bk, bhh], axis=1)
    wb_t = wb.T            # (1, H) row vector for the VPU dot
    # columns: [ e (C2) | v (C2) ]
    w_ev = jnp.concatenate([we, wv], axis=1)
    b_ev = jnp.concatenate([be, bv], axis=1)
    return (w_pre, b_pre, wb_t, bb, wih, bih, w_ev, b_ev, w1, b1, w2, b2)


# ----------------------------------------------------------------------------------
# NTM.forward (config: exp_config=['no_rep'], v=0, no 'act', no 'no_mem')
# ----------------------------------------------------------------------------------
def ntm_forward(h_o_prev, y_e_prev, C_o, packed, cfg):
    # h_o_prev: (N, O, H), y_e_prev: (N, O, dim_y_e), C_o: (N, C2_1, C2_2)
    N, O, H = h_o_prev.shape
    del y_e_prev  # only used by the disabled permutation ('no_rep') / 'act' branches

    de, dl, dp = cfg['dim_y_e'], cfg['dim_y_l'], cfg['dim_y_p']
    D, hh, ww = cfg['D'], cfg['h'], cfg['w']
    dYs, dYa = 1 * hh * ww, D * hh * ww
    dims = (de, dl, dp, dYs, dYa)
    used = H + de + dl + dp + dYs + dYa
    ROWS = ((N * O + 7) // 8) * 8
    LANES = ((used + 127) // 128) * 128

    # contiguous flatten (row = n*O + o): pure bitcast, no transpose / extra XLA kernel
    h_flat = h_o_prev.reshape(N * O, H)

    n_in = 2 + len(packed)
    slab = pl.pallas_call(
        functools.partial(_ntm_fused_kernel, dims=dims),
        out_shape=jax.ShapeDtypeStruct((ROWS, LANES), jnp.float32),
        in_specs=[pl.BlockSpec(memory_space=pltpu.MemorySpace.VMEM)] * n_in,
        out_specs=pl.BlockSpec(memory_space=pltpu.MemorySpace.VMEM),
        cost_estimate=pl.CostEstimate(flops=220_000, transcendentals=1_600,
                                      bytes_accessed=90_000),
    )(h_flat, C_o, *packed)

    rows = slab[:N * O]
    c0 = 0
    h_o = rows[:, c0:c0 + H].reshape(N, O, H);            c0 += H
    y_e = rows[:, c0:c0 + de].reshape(N, O, de);          c0 += de
    a_l = rows[:, c0:c0 + dl];                            c0 += dl
    y_p = rows[:, c0:c0 + dp].reshape(N, O, dp);          c0 += dp
    Y_s = rows[:, c0:c0 + dYs].reshape(N, O, 1, hh, ww);  c0 += dYs
    Y_a = rows[:, c0:c0 + dYa].reshape(N, O, D, hh, ww)

    # TODO(synk): smd.STGumbelSoftmax adds Gumbel noise at train time; deterministic
    # straight-through hard one-hot (eval behaviour, argmax of the logits) is used here.
    y_l = jax.nn.one_hot(jnp.argmax(a_l, axis=-1), dl, dtype=jnp.float32).reshape(N, O, dl)

    return h_o, y_e, y_l, y_p, Y_s, Y_a


# ----------------------------------------------------------------------------------
# Deterministic parameter init (shapes match the module's __init__; Linear weights
# are stored pre-transposed as (in, out) so y = x @ W + b)
# ----------------------------------------------------------------------------------
def init_params(key, H, C2, dim_y, fcn_hidden):
    keys = jax.random.split(key, 8)

    def lin(kk, fan_in, fan_out):
        kw, kb = jax.random.split(kk)
        w = jax.random.normal(kw, (fan_in, fan_out), jnp.float32) * (1.0 / np.sqrt(fan_in))
        b = jax.random.normal(kb, (1, fan_out), jnp.float32) * 0.01
        return w, b

    wk, bk = lin(keys[0], H, C2)          # linear_k
    wb, bb = lin(keys[1], H, 1)           # linear_b
    wih, bih = lin(keys[2], C2, 3 * H)    # GRUCell weight_ih^T / bias_ih
    whh, bhh = lin(keys[3], H, 3 * H)     # GRUCell weight_hh^T / bias_hh
    we, be = lin(keys[4], H, C2)          # linear_e
    wv, bv = lin(keys[5], H, C2)          # linear_v
    w1, b1 = lin(keys[6], H, fcn_hidden)        # FCN layer 1
    w2, b2 = lin(keys[7], fcn_hidden, dim_y)    # FCN layer 2
    return {
        'cell': (wk, bk, wb, bb, wih, bih, whh, bhh, we, be, wv, bv),
        'fcn': (w1, b1, w2, b2),
    }


if __name__ == "__main__":
    # o.*: dim_h_o=32, dim_C2_1=16, dim_C2_2=32, O=3, dim_y_e=1, dim_y_l=4, dim_y_p=3,
    #      D=2, h=4, w=4 (dim_Y_s=16, dim_Y_a=32), fcn=[64], exp_config=['no_rep'], v=0
    N, O = 2, 3
    H = 32
    C1, C2 = 16, 32
    de, dl, dp = 1, 4, 3
    D, hh, ww = 2, 4, 4
    dim_y = de + dl + dp + 1 * hh * ww + D * hh * ww   # = 56

    key = jax.random.PRNGKey(0)
    k1, k2, k3, kp = jax.random.split(key, 4)
    h_o_prev = jax.random.normal(k1, (N, O, H), jnp.float32)
    y_e_prev = jax.random.uniform(k2, (N, O, de), jnp.float32)
    C_o = jax.random.normal(k3, (N, C1, C2), jnp.float32)

    params = init_params(kp, H, C2, dim_y, 64)
    packed = pack_params(params)                      # fuse shared-input weights once
    cfg = dict(dim_y_e=de, dim_y_l=dl, dim_y_p=dp, D=D, h=hh, w=ww)

    fwd = jax.jit(functools.partial(ntm_forward, cfg=cfg))
    outs = fwd(h_o_prev, y_e_prev, C_o, packed)
    jax.block_until_ready(outs)
    print("KERNEL_OK")
</pallas_src>

<mosaic_0001>
module attributes {stable_mosaic.version = 11 : i64} {
  func.func @_ntm_fused_kernel(%arg0: memref<6x32xf32, #tpu.memory_space<vmem>>, %arg1: memref<2x16x32xf32, #tpu.memory_space<vmem>>, %arg2: memref<32x128xf32, #tpu.memory_space<vmem>>, %arg3: memref<1x128xf32, #tpu.memory_space<vmem>>, %arg4: memref<1x32xf32, #tpu.memory_space<vmem>>, %arg5: memref<1x1xf32, #tpu.memory_space<vmem>>, %arg6: memref<32x96xf32, #tpu.memory_space<vmem>>, %arg7: memref<1x96xf32, #tpu.memory_space<vmem>>, %arg8: memref<32x64xf32, #tpu.memory_space<vmem>>, %arg9: memref<1x64xf32, #tpu.memory_space<vmem>>, %arg10: memref<32x64xf32, #tpu.memory_space<vmem>>, %arg11: memref<1x64xf32, #tpu.memory_space<vmem>>, %arg12: memref<64x56xf32, #tpu.memory_space<vmem>>, %arg13: memref<1x56xf32, #tpu.memory_space<vmem>>, %arg14: memref<8x128xf32, #tpu.memory_space<vmem>>) attributes {dimension_semantics = [], scalar_prefetch = 0 : i64, scratch_operands = 0 : i64, tpu.core_type = #tpu.core_type<tc>} {
    %c0 = arith.constant 0 : index
    %c0_0 = arith.constant 0 : index
    %0 = vector.load %arg0[%c0, %c0_0] : memref<6x32xf32, #tpu.memory_space<vmem>>, vector<6x32xf32>
    %c0_1 = arith.constant 0 : index
    %c0_2 = arith.constant 0 : index
    %c0_3 = arith.constant 0 : index
    %1 = vector.load %arg1[%c0_1, %c0_2, %c0_3] : memref<2x16x32xf32, #tpu.memory_space<vmem>>, vector<2x16x32xf32>
    %c0_4 = arith.constant 0 : index
    %c0_5 = arith.constant 0 : index
    %2 = vector.load %arg2[%c0_4, %c0_5] : memref<32x128xf32, #tpu.memory_space<vmem>>, vector<32x128xf32>
    %cst = arith.constant dense<0.000000e+00> : vector<6x128xf32>
    %3 = tpu.matmul %0, %2, %cst {dimension_numbers = #tpu.dot_dimension_numbers<[1], [0], [0], [1], [0, 0, 1, 1], [], []>} : vector<6x32xf32>, vector<32x128xf32>, vector<6x128xf32> -> vector<6x128xf32>
    %c0_6 = arith.constant 0 : index
    %c0_7 = arith.constant 0 : index
    %4 = vector.load %arg3[%c0_6, %c0_7] : memref<1x128xf32, #tpu.memory_space<vmem>>, vector<1x128xf32>
    %5 = vector.broadcast %4 : vector<1x128xf32> to vector<6x128xf32>
    %6 = arith.addf %3, %5 : vector<6x128xf32>
    %7 = vector.shape_cast %6 : vector<6x128xf32> to vector<2x3x128xf32>
    %8 = vector.shape_cast %0 : vector<6x32xf32> to vector<2x3x32xf32>
    %9 = vector.extract_strided_slice %7 {offsets = [0, 0, 0], sizes = [2, 1, 128], strides = [1, 1, 1]} : vector<2x3x128xf32> to vector<2x1x128xf32>
    %10 = vector.shape_cast %9 : vector<2x1x128xf32> to vector<2x128xf32>
    %11 = vector.extract_strided_slice %10 {offsets = [0, 0], sizes = [2, 32], strides = [1, 1]} : vector<2x128xf32> to vector<2x32xf32>
    %12 = vector.extract_strided_slice %10 {offsets = [0, 32], sizes = [2, 32], strides = [1, 1]} : vector<2x128xf32> to vector<2x32xf32>
    %13 = vector.extract_strided_slice %10 {offsets = [0, 64], sizes = [2, 32], strides = [1, 1]} : vector<2x128xf32> to vector<2x32xf32>
    %14 = vector.extract_strided_slice %10 {offsets = [0, 96], sizes = [2, 32], strides = [1, 1]} : vector<2x128xf32> to vector<2x32xf32>
    %15 = vector.extract_strided_slice %8 {offsets = [0, 0, 0], sizes = [2, 1, 32], strides = [1, 1, 1]} : vector<2x3x32xf32> to vector<2x1x32xf32>
    %16 = vector.shape_cast %15 : vector<2x1x32xf32> to vector<2x32xf32>
    %c0_8 = arith.constant 0 : index
    %c0_9 = arith.constant 0 : index
    %17 = vector.load %arg4[%c0_8, %c0_9] : memref<1x32xf32, #tpu.memory_space<vmem>>, vector<1x32xf32>
    %18 = vector.broadcast %17 : vector<1x32xf32> to vector<2x32xf32>
    %19 = arith.mulf %16, %18 : vector<2x32xf32>
    %cst_10 = arith.constant dense<0.000000e+00> : vector<2xf32>
    %20 = vector.multi_reduction <add>, %19, %cst_10 [1] : vector<2x32xf32> to vector<2xf32>
    %21 = vector.shape_cast %20 : vector<2xf32> to vector<2x1xf32>
    %c0_11 = arith.constant 0 : index
    %c0_12 = arith.constant 0 : index
    %22 = vector.load %arg5[%c0_11, %c0_12] : memref<1x1xf32, #tpu.memory_space<vmem>>, vector<1x1xf32>
    %23 = vector.broadcast %22 : vector<1x1xf32> to vector<2x1xf32>
    %24 = arith.addf %21, %23 : vector<2x1xf32>
    %cst_13 = arith.constant 0.000000e+00 : f32
    %25 = vector.broadcast %cst_13 : f32 to vector<2x1xf32>
    %26 = arith.maximumf %24, %25 : vector<2x1xf32>
    %27 = math.absf %24 : vector<2x1xf32>
    %cst_14 = arith.constant 0.000000e+00 : f32
    %28 = vector.broadcast %cst_14 : f32 to vector<2x1xf32>
    %29 = arith.subf %28, %27 : vector<2x1xf32>
    %30 = math.exp %29 : vector<2x1xf32>
    %31 = math.log1p %30 : vector<2x1xf32>
    %32 = arith.addf %26, %31 : vector<2x1xf32>
    %cst_15 = arith.constant 1.000000e+00 : f32
    %33 = vector.broadcast %cst_15 : f32 to vector<2x1xf32>
    %34 = arith.addf %32, %33 : vector<2x1xf32>
    %35 = arith.mulf %11, %11 : vector<2x32xf32>
    %cst_16 = arith.constant dense<0.000000e+00> : vector<2xf32>
    %36 = vector.multi_reduction <add>, %35, %cst_16 [1] : vector<2x32xf32> to vector<2xf32>
    %37 = vector.shape_cast %36 : vector<2xf32> to vector<2x1xf32>
    %38 = math.sqrt %37 : vector<2x1xf32>
    %39 = vector.shape_cast %11 : vector<2x32xf32> to vector<2x1x32xf32>
    %40 = vector.broadcast %39 : vector<2x1x32xf32> to vector<2x16x32xf32>
    %41 = arith.mulf %40, %1 : vector<2x16x32xf32>
    %cst_17 = arith.constant dense<0.000000e+00> : vector<2x16xf32>
    %42 = vector.multi_reduction <add>, %41, %cst_17 [2] : vector<2x16x32xf32> to vector<2x16xf32>
    %43 = arith.mulf %1, %1 : vector<2x16x32xf32>
    %cst_18 = arith.constant dense<0.000000e+00> : vector<2x16xf32>
    %44 = vector.multi_reduction <add>, %43, %cst_18 [2] : vector<2x16x32xf32> to vector<2x16xf32>
    %45 = math.sqrt %44 : vector<2x16xf32>
    %46 = vector.broadcast %38 : vector<2x1xf32> to vector<2x16xf32>
    %47 = arith.mulf %45, %46 : vector<2x16xf32>
    %cst_19 = arith.constant 9.99999993E-9 : f32
    %48 = vector.broadcast %cst_19 : f32 to vector<2x16xf32>
    %49 = arith.maximumf %47, %48 : vector<2x16xf32>
    %50 = tpu.reciprocal %49 {approx = true} : vector<2x16xf32> -> vector<2x16xf32>
    %51 = arith.mulf %42, %50 : vector<2x16xf32>
    %52 = vector.broadcast %34 : vector<2x1xf32> to vector<2x16xf32>
    %53 = arith.mulf %51, %52 : vector<2x16xf32>
    %cst_20 = arith.constant dense<0xFF800000> : vector<2xf32>
    %54 = vector.multi_reduction <maximumf>, %53, %cst_20 [1] : vector<2x16xf32> to vector<2xf32>
    %55 = vector.shape_cast %54 : vector<2xf32> to vector<2x1xf32>
    %56 = vector.broadcast %55 : vector<2x1xf32> to vector<2x16xf32>
    %57 = arith.subf %53, %56 : vector<2x16xf32>
    %58 = math.exp %57 : vector<2x16xf32>
    %cst_21 = arith.constant dense<0.000000e+00> : vector<2xf32>
    %59 = vector.multi_reduction <add>, %58, %cst_21 [1] : vector<2x16xf32> to vector<2xf32>
    %60 = vector.shape_cast %59 : vector<2xf32> to vector<2x1xf32>
    %61 = tpu.reciprocal %60 {approx = true} : vector<2x1xf32> -> vector<2x1xf32>
    %62 = vector.broadcast %61 : vector<2x1xf32> to vector<2x16xf32>
    %63 = arith.mulf %58, %62 : vector<2x16xf32>
    %64 = vector.shape_cast %63 : vector<2x16xf32> to vector<2x16x1xf32>
    %65 = vector.broadcast %64 : vector<2x16x1xf32> to vector<2x16x32xf32>
    %66 = arith.mulf %65, %1 : vector<2x16x32xf32>
    %cst_22 = arith.constant dense<0.000000e+00> : vector<2x32xf32>
    %67 = vector.multi_reduction <add>, %66, %cst_22 [1] : vector<2x16x32xf32> to vector<2x32xf32>
    %c0_23 = arith.constant 0 : index
    %c0_24 = arith.constant 0 : index
    %68 = vector.load %arg6[%c0_23, %c0_24] : memref<32x96xf32, #tpu.memory_space<vmem>>, vector<32x96xf32>
    %cst_25 = arith.constant dense<0.000000e+00> : vector<2x96xf32>
    %69 = tpu.matmul %67, %68, %cst_25 {dimension_numbers = #tpu.dot_dimension_numbers<[1], [0], [0], [1], [0, 0, 1, 1], [], []>} : vector<2x32xf32>, vector<32x96xf32>, vector<2x96xf32> -> vector<2x96xf32>
    %c0_26 = arith.constant 0 : index
    %c0_27 = arith.constant 0 : index
    %70 = vector.load %arg7[%c0_26, %c0_27] : memref<1x96xf32, #tpu.memory_space<vmem>>, vector<1x96xf32>
    %71 = vector.broadcast %70 : vector<1x96xf32> to vector<2x96xf32>
    %72 = arith.addf %69, %71 : vector<2x96xf32>
    %73 = vector.extract_strided_slice %72 {offsets = [0, 0], sizes = [2, 32], strides = [1, 1]} : vector<2x96xf32> to vector<2x32xf32>
    %74 = arith.addf %73, %12 : vector<2x32xf32>
    %75 = arith.negf %74 : vector<2x32xf32>
    %76 = math.exp %75 : vector<2x32xf32>
    %cst_28 = arith.constant 1.000000e+00 : f32
    %77 = vector.broadcast %cst_28 : f32 to vector<2x32xf32>
    %78 = arith.addf %77, %76 : vector<2x32xf32>
    %79 = arith.divf %77, %78 : vector<2x32xf32>
    %80 = vector.extract_strided_slice %72 {offsets = [0, 32], sizes = [2, 32], strides = [1, 1]} : vector<2x96xf32> to vector<2x32xf32>
    %81 = arith.addf %80, %13 : vector<2x32xf32>
    %82 = arith.negf %81 : vector<2x32xf32>
    %83 = math.exp %82 : vector<2x32xf32>
    %cst_29 = arith.constant 1.000000e+00 : f32
    %84 = vector.broadcast %cst_29 : f32 to vector<2x32xf32>
    %85 = arith.addf %84, %83 : vector<2x32xf32>
    %86 = arith.divf %84, %85 : vector<2x32xf32>
    %87 = vector.extract_strided_slice %72 {offsets = [0, 64], sizes = [2, 32], strides = [1, 1]} : vector<2x96xf32> to vector<2x32xf32>
    %88 = arith.mulf %79, %14 : vector<2x32xf32>
    %89 = arith.addf %87, %88 : vector<2x32xf32>
    %90 = math.tanh %89 : vector<2x32xf32>
    %cst_30 = arith.constant 1.000000e+00 : f32
    %91 = vector.broadcast %cst_30 : f32 to vector<2x32xf32>
    %92 = arith.subf %91, %86 : vector<2x32xf32>
    %93 = arith.mulf %92, %90 : vector<2x32xf32>
    %94 = arith.mulf %86, %16 : vector<2x32xf32>
    %95 = arith.addf %93, %94 : vector<2x32xf32>
    %c0_31 = arith.constant 0 : index
    %c0_32 = arith.constant 0 : index
    %96 = vector.load %arg8[%c0_31, %c0_32] : memref<32x64xf32, #tpu.memory_space<vmem>>, vector<32x64xf32>
    %cst_33 = arith.constant dense<0.000000e+00> : vector<2x64xf32>
    %97 = tpu.matmul %95, %96, %cst_33 {dimension_numbers = #tpu.dot_dimension_numbers<[1], [0], [0], [1], [0, 0, 1, 1], [], []>} : vector<2x32xf32>, vector<32x64xf32>, vector<2x64xf32> -> vector<2x64xf32>
    %c0_34 = arith.constant 0 : index
    %c0_35 = arith.constant 0 : index
    %98 = vector.load %arg9[%c0_34, %c0_35] : memref<1x64xf32, #tpu.memory_space<vmem>>, vector<1x64xf32>
    %99 = vector.broadcast %98 : vector<1x64xf32> to vector<2x64xf32>
    %100 = arith.addf %97, %99 : vector<2x64xf32>
    %101 = vector.extract_strided_slice %100 {offsets = [0, 0], sizes = [2, 32], strides = [1, 1]} : vector<2x64xf32> to vector<2x32xf32>
    %102 = arith.negf %101 : vector<2x32xf32>
    %103 = math.exp %102 : vector<2x32xf32>
    %cst_36 = arith.constant 1.000000e+00 : f32
    %104 = vector.broadcast %cst_36 : f32 to vector<2x32xf32>
    %105 = arith.addf %104, %103 : vector<2x32xf32>
    %106 = arith.divf %104, %105 : vector<2x32xf32>
    %107 = vector.extract_strided_slice %100 {offsets = [0, 32], sizes = [2, 32], strides = [1, 1]} : vector<2x64xf32> to vector<2x32xf32>
    %108 = vector.shape_cast %63 : vector<2x16xf32> to vector<2x16x1xf32>
    %109 = vector.shape_cast %106 : vector<2x32xf32> to vector<2x1x32xf32>
    %110 = vector.broadcast %108 : vector<2x16x1xf32> to vector<2x16x32xf32>
    %111 = vector.broadcast %109 : vector<2x1x32xf32> to vector<2x16x32xf32>
    %112 = arith.mulf %110, %111 : vector<2x16x32xf32>
    %cst_37 = arith.constant 1.000000e+00 : f32
    %113 = vector.broadcast %cst_37 : f32 to vector<2x16x32xf32>
    %114 = arith.subf %113, %112 : vector<2x16x32xf32>
    %115 = arith.mulf %1, %114 : vector<2x16x32xf32>
    %116 = vector.shape_cast %107 : vector<2x32xf32> to vector<2x1x32xf32>
    %117 = vector.broadcast %108 : vector<2x16x1xf32> to vector<2x16x32xf32>
    %118 = vector.broadcast %116 : vector<2x1x32xf32> to vector<2x16x32xf32>
    %119 = arith.mulf %117, %118 : vector<2x16x32xf32>
    %120 = arith.addf %115, %119 : vector<2x16x32xf32>
    %121 = vector.extract_strided_slice %7 {offsets = [0, 1, 0], sizes = [2, 1, 128], strides = [1, 1, 1]} : vector<2x3x128xf32> to vector<2x1x128xf32>
    %122 = vector.shape_cast %121 : vector<2x1x128xf32> to vector<2x128xf32>
    %123 = vector.extract_strided_slice %122 {offsets = [0, 0], sizes = [2, 32], strides = [1, 1]} : vector<2x128xf32> to vector<2x32xf32>
    %124 = vector.extract_strided_slice %122 {offsets = [0, 32], sizes = [2, 32], strides = [1, 1]} : vector<2x128xf32> to vector<2x32xf32>
    %125 = vector.extract_strided_slice %122 {offsets = [0, 64], sizes = [2, 32], strides = [1, 1]} : vector<2x128xf32> to vector<2x32xf32>
    %126 = vector.extract_strided_slice %122 {offsets = [0, 96], sizes = [2, 32], strides = [1, 1]} : vector<2x128xf32> to vector<2x32xf32>
    %127 = vector.extract_strided_slice %8 {offsets = [0, 1, 0], sizes = [2, 1, 32], strides = [1, 1, 1]} : vector<2x3x32xf32> to vector<2x1x32xf32>
    %128 = vector.shape_cast %127 : vector<2x1x32xf32> to vector<2x32xf32>
    %c0_38 = arith.constant 0 : index
    %c0_39 = arith.constant 0 : index
    %129 = vector.load %arg4[%c0_38, %c0_39] : memref<1x32xf32, #tpu.memory_space<vmem>>, vector<1x32xf32>
    %130 = vector.broadcast %129 : vector<1x32xf32> to vector<2x32xf32>
    %131 = arith.mulf %128, %130 : vector<2x32xf32>
    %cst_40 = arith.constant dense<0.000000e+00> : vector<2xf32>
    %132 = vector.multi_reduction <add>, %131, %cst_40 [1] : vector<2x32xf32> to vector<2xf32>
    %133 = vector.shape_cast %132 : vector<2xf32> to vector<2x1xf32>
    %c0_41 = arith.constant 0 : index
    %c0_42 = arith.constant 0 : index
    %134 = vector.load %arg5[%c0_41, %c0_42] : memref<1x1xf32, #tpu.memory_space<vmem>>, vector<1x1xf32>
    %135 = vector.broadcast %134 : vector<1x1xf32> to vector<2x1xf32>
    %136 = arith.addf %133, %135 : vector<2x1xf32>
    %cst_43 = arith.constant 0.000000e+00 : f32
    %137 = vector.broadcast %cst_43 : f32 to vector<2x1xf32>
    %138 = arith.maximumf %136, %137 : vector<2x1xf32>
    %139 = math.absf %136 : vector<2x1xf32>
    %cst_44 = arith.constant 0.000000e+00 : f32
    %140 = vector.broadcast %cst_44 : f32 to vector<2x1xf32>
    %141 = arith.subf %140, %139 : vector<2x1xf32>
    %142 = math.exp %141 : vector<2x1xf32>
    %143 = math.log1p %142 : vector<2x1xf32>
    %144 = arith.addf %138, %143 : vector<2x1xf32>
    %cst_45 = arith.constant 1.000000e+00 : f32
    %145 = vector.broadcast %cst_45 : f32 to vector<2x1xf32>
    %146 = arith.addf %144, %145 : vector<2x1xf32>
    %147 = arith.mulf %123, %123 : vector<2x32xf32>
    %cst_46 = arith.constant dense<0.000000e+00> : vector<2xf32>
    %148 = vector.multi_reduction <add>, %147, %cst_46 [1] : vector<2x32xf32> to vector<2xf32>
    %149 = vector.shape_cast %148 : vector<2xf32> to vector<2x1xf32>
    %150 = math.sqrt %149 : vector<2x1xf32>
    %151 = vector.shape_cast %123 : vector<2x32xf32> to vector<2x1x32xf32>
    %152 = vector.broadcast %151 : vector<2x1x32xf32> to vector<2x16x32xf32>
    %153 = arith.mulf %152, %120 : vector<2x16x32xf32>
    %cst_47 = arith.constant dense<0.000000e+00> : vector<2x16xf32>
    %154 = vector.multi_reduction <add>, %153, %cst_47 [2] : vector<2x16x32xf32> to vector<2x16xf32>
    %155 = arith.mulf %120, %120 : vector<2x16x32xf32>
    %cst_48 = arith.constant dense<0.000000e+00> : vector<2x16xf32>
    %156 = vector.multi_reduction <add>, %155, %cst_48 [2] : vector<2x16x32xf32> to vector<2x16xf32>
    %157 = math.sqrt %156 : vector<2x16xf32>
    %158 = vector.broadcast %150 : vector<2x1xf32> to vector<2x16xf32>
    %159 = arith.mulf %157, %158 : vector<2x16xf32>
    %cst_49 = arith.constant 9.99999993E-9 : f32
    %160 = vector.broadcast %cst_49 : f32 to vector<2x16xf32>
    %161 = arith.maximumf %159, %160 : vector<2x16xf32>
    %162 = tpu.reciprocal %161 {approx = true} : vector<2x16xf32> -> vector<2x16xf32>
    %163 = arith.mulf %154, %162 : vector<2x16xf32>
    %164 = vector.broadcast %146 : vector<2x1xf32> to vector<2x16xf32>
    %165 = arith.mulf %163, %164 : vector<2x16xf32>
    %cst_50 = arith.constant dense<0xFF800000> : vector<2xf32>
    %166 = vector.multi_reduction <maximumf>, %165, %cst_50 [1] : vector<2x16xf32> to vector<2xf32>
    %167 = vector.shape_cast %166 : vector<2xf32> to vector<2x1xf32>
    %168 = vector.broadcast %167 : vector<2x1xf32> to vector<2x16xf32>
    %169 = arith.subf %165, %168 : vector<2x16xf32>
    %170 = math.exp %169 : vector<2x16xf32>
    %cst_51 = arith.constant dense<0.000000e+00> : vector<2xf32>
    %171 = vector.multi_reduction <add>, %170, %cst_51 [1] : vector<2x16xf32> to vector<2xf32>
    %172 = vector.shape_cast %171 : vector<2xf32> to vector<2x1xf32>
    %173 = tpu.reciprocal %172 {approx = true} : vector<2x1xf32> -> vector<2x1xf32>
    %174 = vector.broadcast %173 : vector<2x1xf32> to vector<2x16xf32>
    %175 = arith.mulf %170, %174 : vector<2x16xf32>
    %176 = vector.shape_cast %175 : vector<2x16xf32> to vector<2x16x1xf32>
    %177 = vector.broadcast %176 : vector<2x16x1xf32> to vector<2x16x32xf32>
    %178 = arith.mulf %177, %120 : vector<2x16x32xf32>
    %cst_52 = arith.constant dense<0.000000e+00> : vector<2x32xf32>
    %179 = vector.multi_reduction <add>, %178, %cst_52 [1] : vector<2x16x32xf32> to vector<2x32xf32>
    %c0_53 = arith.constant 0 : index
    %c0_54 = arith.constant 0 : index
    %180 = vector.load %arg6[%c0_53, %c0_54] : memref<32x96xf32, #tpu.memory_space<vmem>>, vector<32x96xf32>
    %cst_55 = arith.constant dense<0.000000e+00> : vector<2x96xf32>
    %181 = tpu.matmul %179, %180, %cst_55 {dimension_numbers = #tpu.dot_dimension_numbers<[1], [0], [0], [1], [0, 0, 1, 1], [], []>} : vector<2x32xf32>, vector<32x96xf32>, vector<2x96xf32> -> vector<2x96xf32>
    %c0_56 = arith.constant 0 : index
    %c0_57 = arith.constant 0 : index
    %182 = vector.load %arg7[%c0_56, %c0_57] : memref<1x96xf32, #tpu.memory_space<vmem>>, vector<1x96xf32>
    %183 = vector.broadcast %182 : vector<1x96xf32> to vector<2x96xf32>
    %184 = arith.addf %181, %183 : vector<2x96xf32>
    %185 = vector.extract_strided_slice %184 {offsets = [0, 0], sizes = [2, 32], strides = [1, 1]} : vector<2x96xf32> to vector<2x32xf32>
    %186 = arith.addf %185, %124 : vector<2x32xf32>
    %187 = arith.negf %186 : vector<2x32xf32>
    %188 = math.exp %187 : vector<2x32xf32>
    %cst_58 = arith.constant 1.000000e+00 : f32
    %189 = vector.broadcast %cst_58 : f32 to vector<2x32xf32>
    %190 = arith.addf %189, %188 : vector<2x32xf32>
    %191 = arith.divf %189, %190 : vector<2x32xf32>
    %192 = vector.extract_strided_slice %184 {offsets = [0, 32], sizes = [2, 32], strides = [1, 1]} : vector<2x96xf32> to vector<2x32xf32>
    %193 = arith.addf %192, %125 : vector<2x32xf32>
    %194 = arith.negf %193 : vector<2x32xf32>
    %195 = math.exp %194 : vector<2x32xf32>
    %cst_59 = arith.constant 1.000000e+00 : f32
    %196 = vector.broadcast %cst_59 : f32 to vector<2x32xf32>
    %197 = arith.addf %196, %195 : vector<2x32xf32>
    %198 = arith.divf %196, %197 : vector<2x32xf32>
    %199 = vector.extract_strided_slice %184 {offsets = [0, 64], sizes = [2, 32], strides = [1, 1]} : vector<2x96xf32> to vector<2x32xf32>
    %200 = arith.mulf %191, %126 : vector<2x32xf32>
    %201 = arith.addf %199, %200 : vector<2x32xf32>
    %202 = math.tanh %201 : vector<2x32xf32>
    %cst_60 = arith.constant 1.000000e+00 : f32
    %203 = vector.broadcast %cst_60 : f32 to vector<2x32xf32>
    %204 = arith.subf %203, %198 : vector<2x32xf32>
    %205 = arith.mulf %204, %202 : vector<2x32xf32>
    %206 = arith.mulf %198, %128 : vector<2x32xf32>
    %207 = arith.addf %205, %206 : vector<2x32xf32>
    %c0_61 = arith.constant 0 : index
    %c0_62 = arith.constant 0 : index
    %208 = vector.load %arg8[%c0_61, %c0_62] : memref<32x64xf32, #tpu.memory_space<vmem>>, vector<32x64xf32>
    %cst_63 = arith.constant dense<0.000000e+00> : vector<2x64xf32>
    %209 = tpu.matmul %207, %208, %cst_63 {dimension_numbers = #tpu.dot_dimension_numbers<[1], [0], [0], [1], [0, 0, 1, 1], [], []>} : vector<2x32xf32>, vector<32x64xf32>, vector<2x64xf32> -> vector<2x64xf32>
    %c0_64 = arith.constant 0 : index
    %c0_65 = arith.constant 0 : index
    %210 = vector.load %arg9[%c0_64, %c0_65] : memref<1x64xf32, #tpu.memory_space<vmem>>, vector<1x64xf32>
    %211 = vector.broadcast %210 : vector<1x64xf32> to vector<2x64xf32>
    %212 = arith.addf %209, %211 : vector<2x64xf32>
    %213 = vector.extract_strided_slice %212 {offsets = [0, 0], sizes = [2, 32], strides = [1, 1]} : vector<2x64xf32> to vector<2x32xf32>
    %214 = arith.negf %213 : vector<2x32xf32>
    %215 = math.exp %214 : vector<2x32xf32>
    %cst_66 = arith.constant 1.000000e+00 : f32
    %216 = vector.broadcast %cst_66 : f32 to vector<2x32xf32>
    %217 = arith.addf %216, %215 : vector<2x32xf32>
    %218 = arith.divf %216, %217 : vector<2x32xf32>
    %219 = vector.extract_strided_slice %212 {offsets = [0, 32], sizes = [2, 32], strides = [1, 1]} : vector<2x64xf32> to vector<2x32xf32>
    %220 = vector.shape_cast %175 : vector<2x16xf32> to vector<2x16x1xf32>
    %221 = vector.shape_cast %218 : vector<2x32xf32> to vector<2x1x32xf32>
    %222 = vector.broadcast %220 : vector<2x16x1xf32> to vector<2x16x32xf32>
    %223 = vector.broadcast %221 : vector<2x1x32xf32> to vector<2x16x32xf32>
    %224 = arith.mulf %222, %223 : vector<2x16x32xf32>
    %cst_67 = arith.constant 1.000000e+00 : f32
    %225 = vector.broadcast %cst_67 : f32 to vector<2x16x32xf32>
    %226 = arith.subf %225, %224 : vector<2x16x32xf32>
    %227 = arith.mulf %120, %226 : vector<2x16x32xf32>
    %228 = vector.shape_cast %219 : vector<2x32xf32> to vector<2x1x32xf32>
    %229 = vector.broadcast %220 : vector<2x16x1xf32> to vector<2x16x32xf32>
    %230 = vector.broadcast %228 : vector<2x1x32xf32> to vector<2x16x32xf32>
    %231 = arith.mulf %229, %230 : vector<2x16x32xf32>
    %232 = arith.addf %227, %231 : vector<2x16x32xf32>
    %233 = vector.extract_strided_slice %7 {offsets = [0, 2, 0], sizes = [2, 1, 128], strides = [1, 1, 1]} : vector<2x3x128xf32> to vector<2x1x128xf32>
    %234 = vector.shape_cast %233 : vector<2x1x128xf32> to vector<2x128xf32>
    %235 = vector.extract_strided_slice %234 {offsets = [0, 0], sizes = [2, 32], strides = [1, 1]} : vector<2x128xf32> to vector<2x32xf32>
    %236 = vector.extract_strided_slice %234 {offsets = [0, 32], sizes = [2, 32], strides = [1, 1]} : vector<2x128xf32> to vector<2x32xf32>
    %237 = vector.extract_strided_slice %234 {offsets = [0, 64], sizes = [2, 32], strides = [1, 1]} : vector<2x128xf32> to vector<2x32xf32>
    %238 = vector.extract_strided_slice %234 {offsets = [0, 96], sizes = [2, 32], strides = [1, 1]} : vector<2x128xf32> to vector<2x32xf32>
    %239 = vector.extract_strided_slice %8 {offsets = [0, 2, 0], sizes = [2, 1, 32], strides = [1, 1, 1]} : vector<2x3x32xf32> to vector<2x1x32xf32>
    %240 = vector.shape_cast %239 : vector<2x1x32xf32> to vector<2x32xf32>
    %c0_68 = arith.constant 0 : index
    %c0_69 = arith.constant 0 : index
    %241 = vector.load %arg4[%c0_68, %c0_69] : memref<1x32xf32, #tpu.memory_space<vmem>>, vector<1x32xf32>
    %242 = vector.broadcast %241 : vector<1x32xf32> to vector<2x32xf32>
    %243 = arith.mulf %240, %242 : vector<2x32xf32>
    %cst_70 = arith.constant dense<0.000000e+00> : vector<2xf32>
    %244 = vector.multi_reduction <add>, %243, %cst_70 [1] : vector<2x32xf32> to vector<2xf32>
    %245 = vector.shape_cast %244 : vector<2xf32> to vector<2x1xf32>
    %c0_71 = arith.constant 0 : index
    %c0_72 = arith.constant 0 : index
    %246 = vector.load %arg5[%c0_71, %c0_72] : memref<1x1xf32, #tpu.memory_space<vmem>>, vector<1x1xf32>
    %247 = vector.broadcast %246 : vector<1x1xf32> to vector<2x1xf32>
    %248 = arith.addf %245, %247 : vector<2x1xf32>
    %cst_73 = arith.constant 0.000000e+00 : f32
    %249 = vector.broadcast %cst_73 : f32 to vector<2x1xf32>
    %250 = arith.maximumf %248, %249 : vector<2x1xf32>
    %251 = math.absf %248 : vector<2x1xf32>
    %cst_74 = arith.constant 0.000000e+00 : f32
    %252 = vector.broadcast %cst_74 : f32 to vector<2x1xf32>
    %253 = arith.subf %252, %251 : vector<2x1xf32>
    %254 = math.exp %253 : vector<2x1xf32>
    %255 = math.log1p %254 : vector<2x1xf32>
    %256 = arith.addf %250, %255 : vector<2x1xf32>
    %cst_75 = arith.constant 1.000000e+00 : f32
    %257 = vector.broadcast %cst_75 : f32 to vector<2x1xf32>
    %258 = arith.addf %256, %257 : vector<2x1xf32>
    %259 = arith.mulf %235, %235 : vector<2x32xf32>
    %cst_76 = arith.constant dense<0.000000e+00> : vector<2xf32>
    %260 = vector.multi_reduction <add>, %259, %cst_76 [1] : vector<2x32xf32> to vector<2xf32>
    %261 = vector.shape_cast %260 : vector<2xf32> to vector<2x1xf32>
    %262 = math.sqrt %261 : vector<2x1xf32>
    %263 = vector.shape_cast %235 : vector<2x32xf32> to vector<2x1x32xf32>
    %264 = vector.broadcast %263 : vector<2x1x32xf32> to vector<2x16x32xf32>
    %265 = arith.mulf %264, %232 : vector<2x16x32xf32>
    %cst_77 = arith.constant dense<0.000000e+00> : vector<2x16xf32>
    %266 = vector.multi_reduction <add>, %265, %cst_77 [2] : vector<2x16x32xf32> to vector<2x16xf32>
    %267 = arith.mulf %232, %232 : vector<2x16x32xf32>
    %cst_78 = arith.constant dense<0.000000e+00> : vector<2x16xf32>
    %268 = vector.multi_reduction <add>, %267, %cst_78 [2] : vector<2x16x32xf32> to vector<2x16xf32>
    %269 = math.sqrt %268 : vector<2x16xf32>
    %270 = vector.broadcast %262 : vector<2x1xf32> to vector<2x16xf32>
    %271 = arith.mulf %269, %270 : vector<2x16xf32>
    %cst_79 = arith.constant 9.99999993E-9 : f32
    %272 = vector.broadcast %cst_79 : f32 to vector<2x16xf32>
    %273 = arith.maximumf %271, %272 : vector<2x16xf32>
    %274 = tpu.reciprocal %273 {approx = true} : vector<2x16xf32> -> vector<2x16xf32>
    %275 = arith.mulf %266, %274 : vector<2x16xf32>
    %276 = vector.broadcast %258 : vector<2x1xf32> to vector<2x16xf32>
    %277 = arith.mulf %275, %276 : vector<2x16xf32>
    %cst_80 = arith.constant dense<0xFF800000> : vector<2xf32>
    %278 = vector.multi_reduction <maximumf>, %277, %cst_80 [1] : vector<2x16xf32> to vector<2xf32>
    %279 = vector.shape_cast %278 : vector<2xf32> to vector<2x1xf32>
    %280 = vector.broadcast %279 : vector<2x1xf32> to vector<2x16xf32>
    %281 = arith.subf %277, %280 : vector<2x16xf32>
    %282 = math.exp %281 : vector<2x16xf32>
    %cst_81 = arith.constant dense<0.000000e+00> : vector<2xf32>
    %283 = vector.multi_reduction <add>, %282, %cst_81 [1] : vector<2x16xf32> to vector<2xf32>
    %284 = vector.shape_cast %283 : vector<2xf32> to vector<2x1xf32>
    %285 = tpu.reciprocal %284 {approx = true} : vector<2x1xf32> -> vector<2x1xf32>
    %286 = vector.broadcast %285 : vector<2x1xf32> to vector<2x16xf32>
    %287 = arith.mulf %282, %286 : vector<2x16xf32>
    %288 = vector.shape_cast %287 : vector<2x16xf32> to vector<2x16x1xf32>
    %289 = vector.broadcast %288 : vector<2x16x1xf32> to vector<2x16x32xf32>
    %290 = arith.mulf %289, %232 : vector<2x16x32xf32>
    %cst_82 = arith.constant dense<0.000000e+00> : vector<2x32xf32>
    %291 = vector.multi_reduction <add>, %290, %cst_82 [1] : vector<2x16x32xf32> to vector<2x32xf32>
    %c0_83 = arith.constant 0 : index
    %c0_84 = arith.constant 0 : index
    %292 = vector.load %arg6[%c0_83, %c0_84] : memref<32x96xf32, #tpu.memory_space<vmem>>, vector<32x96xf32>
    %cst_85 = arith.constant dense<0.000000e+00> : vector<2x96xf32>
    %293 = tpu.matmul %291, %292, %cst_85 {dimension_numbers = #tpu.dot_dimension_numbers<[1], [0], [0], [1], [0, 0, 1, 1], [], []>} : vector<2x32xf32>, vector<32x96xf32>, vector<2x96xf32> -> vector<2x96xf32>
    %c0_86 = arith.constant 0 : index
    %c0_87 = arith.constant 0 : index
    %294 = vector.load %arg7[%c0_86, %c0_87] : memref<1x96xf32, #tpu.memory_space<vmem>>, vector<1x96xf32>
    %295 = vector.broadcast %294 : vector<1x96xf32> to vector<2x96xf32>
    %296 = arith.addf %293, %295 : vector<2x96xf32>
    %297 = vector.extract_strided_slice %296 {offsets = [0, 0], sizes = [2, 32], strides = [1, 1]} : vector<2x96xf32> to vector<2x32xf32>
    %298 = arith.addf %297, %236 : vector<2x32xf32>
    %299 = arith.negf %298 : vector<2x32xf32>
    %300 = math.exp %299 : vector<2x32xf32>
    %cst_88 = arith.constant 1.000000e+00 : f32
    %301 = vector.broadcast %cst_88 : f32 to vector<2x32xf32>
    %302 = arith.addf %301, %300 : vector<2x32xf32>
    %303 = arith.divf %301, %302 : vector<2x32xf32>
    %304 = vector.extract_strided_slice %296 {offsets = [0, 32], sizes = [2, 32], strides = [1, 1]} : vector<2x96xf32> to vector<2x32xf32>
    %305 = arith.addf %304, %237 : vector<2x32xf32>
    %306 = arith.negf %305 : vector<2x32xf32>
    %307 = math.exp %306 : vector<2x32xf32>
    %cst_89 = arith.constant 1.000000e+00 : f32
    %308 = vector.broadcast %cst_89 : f32 to vector<2x32xf32>
    %309 = arith.addf %308, %307 : vector<2x32xf32>
    %310 = arith.divf %308, %309 : vector<2x32xf32>
    %311 = vector.extract_strided_slice %296 {offsets = [0, 64], sizes = [2, 32], strides = [1, 1]} : vector<2x96xf32> to vector<2x32xf32>
    %312 = arith.mulf %303, %238 : vector<2x32xf32>
    %313 = arith.addf %311, %312 : vector<2x32xf32>
    %314 = math.tanh %313 : vector<2x32xf32>
    %cst_90 = arith.constant 1.000000e+00 : f32
    %315 = vector.broadcast %cst_90 : f32 to vector<2x32xf32>
    %316 = arith.subf %315, %310 : vector<2x32xf32>
    %317 = arith.mulf %316, %314 : vector<2x32xf32>
    %318 = arith.mulf %310, %240 : vector<2x32xf32>
    %319 = arith.addf %317, %318 : vector<2x32xf32>
    %320 = vector.shape_cast %95 : vector<2x32xf32> to vector<2x1x32xf32>
    %321 = vector.shape_cast %207 : vector<2x32xf32> to vector<2x1x32xf32>
    %322 = vector.shape_cast %319 : vector<2x32xf32> to vector<2x1x32xf32>
    %323 = tpu.concatenate %320, %321, %322 in 1 : vector<2x1x32xf32>, vector<2x1x32xf32>, vector<2x1x32xf32> -> vector<2x3x32xf32>
    %324 = vector.shape_cast %323 : vector<2x3x32xf32> to vector<6x32xf32>
    %c0_91 = arith.constant 0 : index
    %c0_92 = arith.constant 0 : index
    %325 = vector.load %arg10[%c0_91, %c0_92] : memref<32x64xf32, #tpu.memory_space<vmem>>, vector<32x64xf32>
    %cst_93 = arith.constant dense<0.000000e+00> : vector<6x64xf32>
    %326 = tpu.matmul %324, %325, %cst_93 {dimension_numbers = #tpu.dot_dimension_numbers<[1], [0], [0], [1], [0, 0, 1, 1], [], []>} : vector<6x32xf32>, vector<32x64xf32>, vector<6x64xf32> -> vector<6x64xf32>
    %c0_94 = arith.constant 0 : index
    %c0_95 = arith.constant 0 : index
    %327 = vector.load %arg11[%c0_94, %c0_95] : memref<1x64xf32, #tpu.memory_space<vmem>>, vector<1x64xf32>
    %328 = vector.broadcast %327 : vector<1x64xf32> to vector<6x64xf32>
    %329 = arith.addf %326, %328 : vector<6x64xf32>
    %cst_96 = arith.constant 0.000000e+00 : f32
    %330 = vector.broadcast %cst_96 : f32 to vector<6x64xf32>
    %331 = arith.maximumf %329, %330 : vector<6x64xf32>
    %c0_97 = arith.constant 0 : index
    %c0_98 = arith.constant 0 : index
    %332 = vector.load %arg12[%c0_97, %c0_98] : memref<64x56xf32, #tpu.memory_space<vmem>>, vector<64x56xf32>
    %cst_99 = arith.constant dense<0.000000e+00> : vector<6x56xf32>
    %333 = tpu.matmul %331, %332, %cst_99 {dimension_numbers = #tpu.dot_dimension_numbers<[1], [0], [0], [1], [0, 0, 1, 1], [], []>} : vector<6x64xf32>, vector<64x56xf32>, vector<6x56xf32> -> vector<6x56xf32>
    %c0_100 = arith.constant 0 : index
    %c0_101 = arith.constant 0 : index
    %334 = vector.load %arg13[%c0_100, %c0_101] : memref<1x56xf32, #tpu.memory_space<vmem>>, vector<1x56xf32>
    %335 = vector.broadcast %334 : vector<1x56xf32> to vector<6x56xf32>
    %336 = arith.addf %333, %335 : vector<6x56xf32>
    %337 = vector.extract_strided_slice %336 {offsets = [0, 0], sizes = [6, 1], strides = [1, 1]} : vector<6x56xf32> to vector<6x1xf32>
    %338 = vector.extract_strided_slice %336 {offsets = [0, 1], sizes = [6, 4], strides = [1, 1]} : vector<6x56xf32> to vector<6x4xf32>
    %339 = vector.extract_strided_slice %336 {offsets = [0, 5], sizes = [6, 3], strides = [1, 1]} : vector<6x56xf32> to vector<6x3xf32>
    %340 = vector.extract_strided_slice %336 {offsets = [0, 8], sizes = [6, 16], strides = [1, 1]} : vector<6x56xf32> to vector<6x16xf32>
    %341 = vector.extract_strided_slice %336 {offsets = [0, 24], sizes = [6, 32], strides = [1, 1]} : vector<6x56xf32> to vector<6x32xf32>
    %342 = math.tanh %337 : vector<6x1xf32>
    %343 = math.absf %342 : vector<6x1xf32>
    %344 = math.tanh %339 : vector<6x3xf32>
    %cst_102 = arith.constant 0.000000e+00 : f32
    %345 = vector.broadcast %cst_102 : f32 to vector<6x16xf32>
    %346 = arith.cmpf ogt, %340, %345 : vector<6x16xf32>
    %347 = arith.extui %346 : vector<6x16xi1> to vector<6x16xi32>
    %348 = arith.sitofp %347 : vector<6x16xi32> to vector<6x16xf32>
    %349 = arith.negf %341 : vector<6x32xf32>
    %350 = math.exp %349 : vector<6x32xf32>
    %cst_103 = arith.constant 1.000000e+00 : f32
    %351 = vector.broadcast %cst_103 : f32 to vector<6x32xf32>
    %352 = arith.addf %351, %350 : vector<6x32xf32>
    %353 = arith.divf %351, %352 : vector<6x32xf32>
    %cst_104 = arith.constant 0.000000e+00 : f32
    %354 = vector.broadcast %cst_104 : f32 to vector<6x40xf32>
    %355 = tpu.concatenate %324, %343, %338, %344, %348, %353, %354 in 1 : vector<6x32xf32>, vector<6x1xf32>, vector<6x4xf32>, vector<6x3xf32>, vector<6x16xf32>, vector<6x32xf32>, vector<6x40xf32> -> vector<6x128xf32>
    %cst_105 = arith.constant 0.000000e+00 : f32
    %356 = vector.broadcast %cst_105 : f32 to vector<2x128xf32>
    %357 = tpu.concatenate %355, %356 in 0 : vector<6x128xf32>, vector<2x128xf32> -> vector<8x128xf32>
    %c0_106 = arith.constant 0 : index
    %c0_107 = arith.constant 0 : index
    %358 = vector.load %arg14[%c0_106, %c0_107] : memref<8x128xf32, #tpu.memory_space<vmem>>, vector<8x128xf32>
    tpu.vector_store %arg14[%c0_106, %c0_107], %357 {strides = array<i32>} : memref<8x128xf32, #tpu.memory_space<vmem>>, vector<8x128xf32>,
    return
  }
}

</mosaic_0001>

<bundles_post_ra>
// kernel: ntm_forward.1
= control target key start
LH: loop header
LB: loop body
LE: loop exit
PB: predicated region body
PF: predicated region fallthrough
CT: control target
= control target key end

     0   :  { %s3707_s0 = inlined_call_operand.vmem [shape: f32[6,32], index: 0, kind: input, shape index: {}]   ;;  %s3708_s1 = inlined_call_operand.vmem [shape: f32[2,16,32], index: 1, kind: input, shape index: {}]   ;;  %s3709_s2 = inlined_call_operand.vmem [shape: f32[32,128], index: 2, kind: input, shape index: {}]   ;;  %s3710_s3 = inlined_call_operand.vmem [shape: f32[1,128], index: 3, kind: input, shape index: {}]   ;;  %s3711_s4 = inlined_call_operand.vmem [shape: f32[1,32], index: 4, kind: input, shape index: {}]   ;;  %s3712_s5 = inlined_call_operand.<no memory space> [shape: f32[1,1], index: 5, kind: input, shape index: {}]   ;;  %s3713_s6 = inlined_call_operand.vmem [shape: f32[32,96], index: 6, kind: input, shape index: {}]   ;;  %s3714_s7 = inlined_call_operand.vmem [shape: f32[1,96], index: 7, kind: input, shape index: {}]   ;;  %s3715_s8 = inlined_call_operand.vmem [shape: f32[32,64], index: 8, kind: input, shape index: {}]   ;;  %s3716_s9 = inlined_call_operand.vmem [shape: f32[1,64], index: 9, kind: input, shape index: {}]   ;;  %s3717_s10 = inlined_call_operand.hbm [shape: f32[32,64], index: 10, kind: input, shape index: {}]   ;;  %s3718_s11 = inlined_call_operand.vmem [shape: f32[1,64], index: 11, kind: input, shape index: {}]   ;;  %s3719_s12 = inlined_call_operand.vmem [shape: f32[64,56], index: 12, kind: input, shape index: {}]   ;;  %s3720_s13 = inlined_call_operand.vmem [shape: f32[1,56], index: 13, kind: input, shape index: {}]   ;;  %s3721_s14 = inlined_call_operand.vmem [shape: f32[8,128], index: 14, kind: output, shape index: {}]  }
   0x1   :  { %v19_v0 = vstv %s3712_s5 }
   0x2   :  { %20 = vst [vmem:[#allocation2] sm:$0x1] %v19_v0 }
   0x3   :  { %21 = vsyncpa [#allocation4], 0  ;;  %s2925_s15 = smov [#allocation3]   ;;  %s2901_s19 = scalar_lea.hbm %s3717_s10, 512 }
   0x4   :  { %s47_s16 = sshll.u32 %s2925_s15, 4  ;;  %p2902_p0 = scmp.ne.s32.totalorder %s3717_s10, %s2901_s19  ;;  %s48_s16 = int_to_ptr.vmem [resolvable:$true] %s47_s16 }
   0x5   :  { %p2905_p1 = scmp.lt.u32.totalorder %s2901_s19, %s3717_s10 }
   0x7   :  { %p2907_p2 = pnand %p2905_p1, %p2902_p0 }
   0x9   :  { %2910 = shalt.err (!%p2907_p2)
}
   0xa   :  { %s2911_s5 = scalar_lea.vmem %s48_s16, 512  ;;  %p2916_p4 = scmp.lt.s32.totalorder %s48_s16, %s48_s16 }
   0xb   :  { %p2912_p3 = scmp.ne.s32.totalorder %s48_s16, %s2911_s5  ;;  %p2917_p5 = scmp.lt.s32.totalorder %s2911_s5, %s2911_s5 }
   0xd   :  { %p2918_p6 = por %p2917_p5, %p2916_p4 }
   0xf   :  { %p2919_p7 = pnand %p2918_p6, %p2912_p3 }
  0x11   :  { %2922 = shalt.err (!%p2919_p7)
}
  0x12   :  { %s2926_s24 = smov 128   ;;  %s2927_s25 = smov 8  }
  0x13   :  { %53 = dma.hbm_to_vmem [thread:$0]  %s3717_s10, 512, %s48_s16, [#allocation4], %s2926_s24, %s2926_s24, %s2927_s25  }
  0x14   :  { %2923 = dma.done.wait [#allocation4], 512  }
  0x15   :  { %2924 = vsyncadd [#allocation4], 4294966784  ;;  %v2928_v1 = vmov 0.0|0.0   ;;  %vm2929_vm0 = vmmov 0   ;;  %v2930_v2 = vmov 0.0   ;;  %v158_v3 = vlaneseq  ;;  %v68_v9 = vld [vmem:[%s3709_s2] sm:$0xff] }
  0x16   :  { %2703 = vmatprep.subr.bf16.mxu0 %v2928_v1  ;;  %2615 = vmatprep.mubr.msk.f32.mxu0 %vm2929_vm0, %v2930_v2  ;;  %v2931_v4 = vmov 1966171168   ;;  %v69_v10 = vld [vmem:[%s3709_s2 + $0x8] sm:$0xff]  ;;  %v70_v11 = vld [vmem:[%s3709_s2 + $0x10] sm:$0xff]  ;;  %v71_v13 = vld [vmem:[%s3709_s2 + $0x18] sm:$0xff]  ;;  %vm79_vm1 = vcmask 261120  }
  0x17   :  { %v156_v5 = vunpack.c.l.s4 %v2931_v4  ;;  %2709 = vmatprep.subr.bf16.mxu1 %v2928_v1  ;;  %2626 = vmatprep.mubr.msk.f32.mxu1 %vm2929_vm0, %v2930_v2  ;;  %v3033_v6 = vshrl.u32 %v158_v3, 7  ;;  %v2704_v12 = vpack.c.bf16 %v69_v10, %v68_v9  ;;  %v3053_v14 = vld [vmem:[%s3707_s0] sm:$0x3f]  ;;  %v2707_v18 = vpack.c.bf16 %v71_v13, %v70_v11  ;;  %v3101_v35 = vld [vmem:[%s3708_s1 + $0x10] sm:$0xff]  ;;  %v3108_v37 = vld [vmem:[%s3708_s1 + $0x8] sm:$0xff]  ;;  %s2934_s10 = smov 32  }
  0x18   :  { %v2543_v15 = vld [vmem:[%s3711_s4] ss:$0 sm:$0xff]  ;;  %vm310_vm2 = vcmask 254976   ;;  %v396_v36 = vmul.f32 %v3101_v35, %v3101_v35  ;;  %v395_v38 = vmul.f32 %v3108_v37, %v3108_v37  ;;  %v3117_v41 = vld [vmem:[%s3708_s1 + $0x18] sm:$0xff]  ;;  %v2932_v44 = vmov 0   ;;  %s2935_s21 = smov 64  }
  0x19   :  { %v157_v7 = vunpack.c.0.s8 %v156_v5  ;;  %2705 = vmatpush3.bf16.msra.mxu0 %v2704_v12  ;;  %v3093_v32 = vld [vmem:[%s3708_s1] sm:$0xff]  ;;  %v397_v42 = vmul.f32 %v3117_v41, %v3117_v41  ;;  %2768 = vset.pattern.permute.xlu0 %v2932_v44  ;;  %v3133_v57 = vsub.s32 0, %v3033_v6  ;;  %vm510_vm14 = vcmask 130112  }
  0x1a   :  { %2706 = vmatprep.subr.bf16.mxu0 %v2928_v1  ;;  %v394_v33 = vmul.f32 %v3093_v32, %v3093_v32  ;;  %v404_v39 = vsel %vm79_vm1, %v396_v36, 0.0  ;;  %v401_v40 = vsel %vm79_vm1, %v395_v38, 0.0  ;;  %2769 = vset.pattern.permute.xlu1 %v2932_v44  ;;  %v3122_v45 = vld [vmem:[#allocation2] ss:$0 sm:$0xff]  ;;  %vm521_vm15 = vcmask 1041409  }
  0x1b   :  { %v3036_v8 = vsub.s32 %v157_v7, %v3033_v6  ;;  %v407_v43 = vsel %vm79_vm1, %v397_v42, 0.0  ;;  %v2541_v49 = vld [vmem:[%s3710_s3] ss:$0 sm:$0xff]  ;;  %s2933_s3 = smov 96  }
  0x1c   :  { %v398_v34 = vsel %vm79_vm1, %v394_v33, 0.0 }
  0x1d   :  { %v214_v16 = vrot.slane %v3053_v14, %v3036_v8  ;;  %v272_v17 = vrot.slane %v2543_v15, %v3036_v8  ;;  %2708 = vmatpush3.bf16.msra.mxu0 %v2707_v18  ;;  %399 = vadd.xlane.f32.xlu1 %v398_v34 }
  0x1e   :  { %2715 = vmatprep.subr.bf16.mxu0 %v2928_v1 }
  0x1f   :  { %v222_v19 = vcombine.high %v214_v16, %v214_v16  ;;  %v3063_v20 = vrot.slane %v214_v16, %v3036_v8  ;;  %v273_v21 = vcombine.high %v272_v17, %v272_v17  ;;  %v3066_v22 = vrot.slane %v272_v17, %v3036_v8 }
  0x20   :  { %2616 = vmatmul.mubr.msk.f32.vlgmr.msra.gmra.mrb[0].mxu0 %vm79_vm1, %v3053_v14 }
  0x21   :  { %v3069_v23 = vrot.slane %v222_v19, %v3036_v8  ;;  %v3072_v24 = vrot.slane %v273_v21, %v3036_v8  ;;  %v290_v26 = vmul.f32 %v3066_v22, %v3063_v20  ;;  %2637 = vmatprep.mubr.msk.f32.mxu0 %vm2929_vm0, %v2930_v2  ;;  %402 = vadd.xlane.f32.xlu1 %v401_v40 }
  0x23   :  { %v3076_v25 = vcombine.high %v3069_v23, %v3069_v23 }
  0x25   :  { %v291_v27 = vmul.f32 %v3072_v24, %v3076_v25  ;;  %408 = vadd.xlane.f32.xlu1 %v407_v43 }
  0x27   :  { %v294_v28 = vcombine.low %v290_v26, %v291_v27 }
  0x29   :  { %v301_v29 = vrot.slane %v294_v28, %v3036_v8 }
  0x2b   :  { %v308_v30 = vrot.slane %v301_v29, %v3036_v8 }
  0x2d   :  { %v311_v31 = vsel %vm310_vm2, %v308_v30, 0.0 }
  0x2e   :  { %312 = vadd.xlane.f32.xlu0 %v311_v31 }
  0x32   :  { %405 = vadd.xlane.f32.xlu0 %v404_v39 }
  0xbb   :  { %v313_v46 = vpop.xlane.xlu0 %312 }
  0xbc   :  { %v3125_v47 = vadd.f32 %v3122_v45, %v313_v46 }
  0xbe   :  { %v323_v48 = vand.u32 2147483647, %v3125_v47 }
  0xc0   :  { %v324_v50 = vsub.f32 0.0, %v323_v48 }
  0xc2   :  { %v325_v54 = vmul.f32 1.442695, %v324_v50 }
  0xc4   :  { %2771 = vpow2.f32 %v325_v54 }
  0xce   :  { %v2772_v33 = vpop.eup %2771 }
  0xcf   :  { %v327_v39 = vadd.f32 1.0, %v2772_v33  ;;  %v330_v46 = vmul.f32 -0.5, %v2772_v33  ;;  %v333_v50 = vand.u32 2147483647, %v2772_v33 }
  0xd1   :  { %2773 = vlog2.f32 %v327_v39  ;;  %v331_v48 = vadd.f32 1.0, %v330_v46  ;;  %vm334_vm3 = vcmp.lt.f32.partialorder %v333_v50, 0.0004427343  ;;  %v3203_v39 = vsub.s32 1, %v3033_v6 }
  0xf3   :  { %v149_v51 = vpop.f32.mrb[0].mxu0 }
  0xf4   :  { %v150_v52 = vadd.f32 %v2541_v49, %v149_v51  ;;  %v2617_v53 = vpop.f32.mrb[1].mxu0  ;;  %v2774_v49 = vpop.eup %2773 }
  0xf5   :  { %v329_v51 = vmul.f32 0.6931472, %v2774_v49  ;;  %v322_v53 = vmax.f32 %v3125_v47, 0.0 }
  0xf6   :  { %v154_v55 = vcombine.high %v150_v52, %v150_v52  ;;  %v161_v56 = vrot.slane %v150_v52, %v3036_v8  ;;  %v332_v52 = vmul.f32 %v2772_v33, %v331_v48 }
  0xf8   :  { %v168_v58 = vrot.slane %v154_v55, %v3036_v8  ;;  %v169_v59 = vcombine.high %v161_v56, %v161_v56  ;;  %v3137_v60 = vrot.slane %v161_v56, %v3036_v8  ;;  %v335_v54 = vsel %vm334_vm3, %v332_v52, %v329_v51 }
  0xf9   :  { %v336_v55 = vadd.f32 %v335_v54, %v322_v53  ;;  %vm524_vm3 = vcmask 123904  }
  0xfa   :  { %v170_v61 = vcombine.high %v168_v58, %v168_v58  ;;  %v3140_v62 = vrot.slane %v168_v58, %v3036_v8  ;;  %v3143_v63 = vrot.slane %v169_v59, %v3036_v8  ;;  %v371_v0 = vrot.slane %v3137_v60, %v3133_v57  ;;  %v400_v58 = vpop.xlane.xlu1 %399 }
  0xfb   :  { %v3164_v10 = vcombine.high %v3137_v60, %v3137_v60  ;;  %v338_v12 = vmul.f32 %v3137_v60, %v3137_v60  ;;  %v337_v56 = vadd.f32 1.0, %v336_v55  ;;  %2775 = vrsqrt.f32 %v400_v58 }
  0xfc   :  { %v3149_v4 = vcombine.high %v3143_v63, %v3143_v63  ;;  %v3153_v5 = vmul.f32 %v3143_v63, %v3143_v63  ;;  %v3157_v7 = vmul.f32 %v3140_v62, %v3140_v62  ;;  %v3160_v9 = vrot.slane %v170_v61, %v3036_v8  ;;  %v406_v61 = vpop.xlane.xlu0 %405 }
  0xfd   :  { %v379_v11 = vmul.f32 %v371_v0, %v3108_v37  ;;  %v1408_v19 = vcombine.low %v3143_v63, %v3140_v62  ;;  %v3183_v27 = vmul.f32 %v3164_v10, %v3164_v10  ;;  %v378_v38 = vmul.f32 %v371_v0, %v3093_v32 }
  0xfe   :  { %v375_v13 = vrot.slane %v3149_v4, %v3133_v57  ;;  %v339_v15 = vmul.f32 %v3149_v4, %v3149_v4  ;;  %v734_v16 = vcombine.low %v3137_v60, %v3149_v4  ;;  %v1033_v17 = vcombine.low %v3153_v5, %v3157_v7  ;;  %v403_v59 = vpop.xlane.xlu1 %402  ;;  %v648_v4 = vld [vmem:[%s3713_s6] sm:$0xff] }
  0xff   :  { %v385_v18 = vsel %vm79_vm1, %v379_v11, 0.0  ;;  %v3187_v28 = vmul.f32 %v3160_v9, %v3160_v9  ;;  %v2071_v40 = vcombine.low %v3164_v10, %v3160_v9  ;;  %v382_v42 = vsel %vm79_vm1, %v378_v38, 0.0 }
 0x100   :  { %386 = vadd.xlane.f32.xlu1 %v385_v18  ;;  %v381_v21 = vmul.f32 %v375_v13, %v3117_v41  ;;  %v342_v26 = vcombine.low %v338_v12, %v339_v15  ;;  %v380_v43 = vmul.f32 %v375_v13, %v3101_v35  ;;  %2777 = vrsqrt.f32 %v406_v61 }
 0x101   :  { %v1696_v31 = vcombine.low %v3183_v27, %v3187_v28  ;;  %2779 = vrsqrt.f32 %v403_v59  ;;  %vm412_vm4 = vcmp.eq.f32.partialorder %v400_v58, inf  ;;  %vm414_vm5 = vcmp.eq.f32.partialorder %v400_v58, 0.0 }
 0x102   :  { %v391_v29 = vsel %vm79_vm1, %v381_v21, 0.0  ;;  %v349_v30 = vrot.slane %v342_v26, %v3036_v8  ;;  %v388_v44 = vsel %vm79_vm1, %v380_v43, 0.0  ;;  %v409_v0 = vpop.xlane.xlu1 %408  ;;  %v415_v26 = vand.u32 2147483648, %v400_v58 }
 0x103   :  { %2781 = vrsqrt.f32 %v409_v0  ;;  %vm426_vm6 = vcmp.eq.f32.partialorder %v406_v61, inf  ;;  %vm428_vm7 = vcmp.eq.f32.partialorder %v406_v61, 0.0  ;;  %vm419_vm8 = vcmp.eq.f32.partialorder %v403_v59, inf }
 0x104   :  { %392 = vadd.xlane.f32.xlu1 %v391_v29  ;;  %v356_v34 = vrot.slane %v349_v30, %v3036_v8  ;;  %vm421_vm9 = vcmp.eq.f32.partialorder %v403_v59, 0.0  ;;  %vm433_vm10 = vcmp.eq.f32.partialorder %v409_v0, inf  ;;  %v436_v49 = vand.u32 2147483648, %v409_v0 }
 0x105   :  { %v2776_v12 = vpop.eup %2775  ;;  %vm435_vm13 = vcmp.eq.f32.partialorder %v409_v0, 0.0 }
 0x106   :  { %v358_v36 = vsel %vm310_vm2, %v356_v34, 0.0  ;;  %v411_v15 = vmul.f32 %v2776_v12, %v400_v58  ;;  %v429_v34 = vand.u32 2147483648, %v406_v61 }
 0x107   :  { %359 = vadd.xlane.f32.xlu0 %v358_v36 }
 0x108   :  { %v413_v21 = vsel %vm412_vm4, %v400_v58, %v411_v15 }
 0x109   :  { %v416_v54 = vsel %vm414_vm5, %v415_v26, %v413_v21 }
 0x10a   :  { %v2778_v13 = vpop.eup %2777 }
 0x10b   :  { %383 = vadd.xlane.f32.xlu0 %v382_v42  ;;  %v2780_v18 = vpop.eup %2779  ;;  %v425_v29 = vmul.f32 %v2778_v13, %v406_v61  ;;  %v422_v42 = vand.u32 2147483648, %v403_v59 }
 0x10c   :  { %v418_v30 = vmul.f32 %v2780_v18, %v403_v59 }
 0x10d   :  { %v2782_v47 = vpop.eup %2781 }
 0x10e   :  { %v432_v36 = vmul.f32 %v2782_v47, %v409_v0  ;;  %v420_v46 = vsel %vm419_vm8, %v403_v59, %v418_v30 }
 0x10f   :  { %389 = vadd.xlane.f32.xlu0 %v388_v44  ;;  %v427_v44 = vsel %vm426_vm6, %v406_v61, %v425_v29  ;;  %v423_v55 = vsel %vm421_vm9, %v422_v42, %v420_v46 }
 0x110   :  { %v434_v51 = vsel %vm433_vm10, %v409_v0, %v432_v36 }
 0x111   :  { %v437_v18 = vsel %vm435_vm13, %v436_v49, %v434_v51 }
 0x125   :  { %467 = vperm.xlu0 %2768, %v337_v56   ;;  %v430_v56 = vsel %vm428_vm7, %v429_v34, %v427_v44 }
 0x18d   :  { %v387_v34 = vpop.xlane.xlu1 %386 }
 0x194   :  { %v360_v11 = vpop.xlane.xlu0 %359 }
 0x195   :  { %2783 = vrsqrt.f32 %v360_v11  ;;  %vm363_vm11 = vcmp.eq.f32.partialorder %v360_v11, inf  ;;  %v366_v43 = vand.u32 2147483648, %v360_v11  ;;  %vm365_vm12 = vcmp.eq.f32.partialorder %v360_v11, 0.0 }
 0x198   :  { %v384_v29 = vpop.xlane.xlu0 %383 }
 0x19c   :  { %v390_v36 = vpop.xlane.xlu0 %389 }
 0x19f   :  { %v2784_v33 = vpop.eup %2783 }
 0x1a0   :  { %v362_v38 = vmul.f32 %v2784_v33, %v360_v11 }
 0x1a2   :  { %v364_v48 = vsel %vm363_vm11, %v360_v11, %v362_v38 }
 0x1a3   :  { %v367_v50 = vsel %vm365_vm12, %v366_v43, %v364_v48 }
 0x1a4   :  { %v442_v52 = vrot.slane %v367_v50, %v3133_v57  ;;  %v446_v53 = vrot.slane %v367_v50, %v3203_v39  ;;  %v468_v58 = vpop.permute.xlu0 %467  ;;  %v393_v50 = vpop.xlane.xlu1 %392 }
 0x1a5   :  { %v472_v61 = vrot.slane %v468_v58, %v3133_v57  ;;  %v476_v49 = vrot.slane %v468_v58, %v3203_v39 }
 0x1a6   :  { %v449_v12 = vmul.f32 %v442_v52, %v416_v54  ;;  %v450_v13 = vmul.f32 %v442_v52, %v423_v55  ;;  %v451_v15 = vmul.f32 %v446_v53, %v430_v56  ;;  %v452_v30 = vmul.f32 %v446_v53, %v437_v18 }
 0x1a7   :  { %v500_v55 = vand.u32 127, %v158_v3 }
 0x1a8   :  { %v453_v47 = vmax.f32 %v449_v12, 1e-08  ;;  %v454_v11 = vmax.f32 %v450_v13, 1e-08  ;;  %v455_v0 = vmax.f32 %v451_v15, 1e-08 }
 0x1a9   :  { %v456_v33 = vmax.f32 %v452_v30, 1e-08  ;;  %v505_v56 = vadd.s32 4294967288, %v500_v55  ;;  %v3217_v18 = vsub.s32 %v500_v55, %v3033_v6 }
 0x1aa   :  { %2785 = vrcp.f32 %v453_v47 }
 0x1ab   :  { %2787 = vrcp.f32 %v454_v11  ;;  %v3214_v13 = vsub.s32 %v505_v56, %v3033_v6 }
 0x1ac   :  { %2789 = vrcp.f32 %v455_v0 }
 0x1ad   :  { %2791 = vrcp.f32 %v456_v33 }
 0x1b4   :  { %v2786_v59 = vpop.eup %2785 }
 0x1b5   :  { %v461_v21 = vmul.f32 %v2786_v59, %v384_v29  ;;  %v2788_v26 = vpop.eup %2787 }
 0x1b6   :  { %v462_v38 = vmul.f32 %v2788_v26, %v387_v34  ;;  %v2790_v43 = vpop.eup %2789 }
 0x1b7   :  { %v479_v42 = vmul.f32 %v472_v61, %v461_v21  ;;  %v463_v44 = vmul.f32 %v2790_v43, %v390_v36  ;;  %v2792_v48 = vpop.eup %2791 }
 0x1b8   :  { %v480_v46 = vmul.f32 %v472_v61, %v462_v38  ;;  %v464_v51 = vmul.f32 %v2792_v48, %v393_v50 }
 0x1b9   :  { %488 = vperm.xlu1 %2769, %v479_v42   ;;  %v481_v52 = vmul.f32 %v476_v49, %v463_v44 }
 0x1ba   :  { %v482_v53 = vmul.f32 %v476_v49, %v464_v51 }
 0x1bd   :  { %491 = vperm.xlu1 %2769, %v480_v46  }
 0x1c1   :  { %494 = vperm.xlu1 %2769, %v481_v52  }
 0x1c5   :  { %497 = vperm.xlu1 %2769, %v482_v53  }
 0x238   :  { %v489_v54 = vpop.permute.xlu1 %488 }
 0x239   :  { %v504_v29 = vrot.slane %v489_v54, %v3217_v18 }
 0x23c   :  { %v492_v12 = vpop.permute.xlu1 %491 }
 0x23d   :  { %v509_v47 = vrot.slane %v492_v12, %v3214_v13 }
 0x23f   :  { %v511_v3 = vsel %vm510_vm14, %v509_v47, %v504_v29 }
 0x240   :  { %v495_v15 = vpop.permute.xlu1 %494 }
 0x241   :  { %v515_v30 = vrot.slane %v495_v15, %v3217_v18 }
 0x244   :  { %v498_v11 = vpop.permute.xlu1 %497 }
 0x245   :  { %v519_v0 = vrot.slane %v498_v11, %v3214_v13 }
 0x247   :  { %v520_v33 = vsel %vm510_vm14, %v519_v0, %v515_v30 }
 0x248   :  { %v522_v36 = vsel %vm521_vm15, %v520_v33, %v511_v3  ;;  %v741_v3 = vrot.slane %v734_v16, %v3036_v8  ;;  %v649_v16 = vld [vmem:[%s3713_s6 + $0x8] sm:$0xff] }
 0x249   :  { %v525_v6 = vsel %vm524_vm3, %v522_v36, -inf }
 0x24a   :  { %526 = vmax.xlane.f32.xlu1 %v525_v6  ;;  %v748_v33 = vrot.slane %v741_v3, %v3036_v8 }
 0x2d7   :  { %v527_v58 = vpop.xlane.xlu1 %526 }
 0x2d8   :  { %v532_v59 = vrot.slane %v527_v58, %v3133_v57  ;;  %v536_v21 = vrot.slane %v527_v58, %v3203_v39 }
 0x2da   :  { %v539_v61 = vsub.f32 %v479_v42, %v532_v59  ;;  %v540_v26 = vsub.f32 %v480_v46, %v532_v59  ;;  %v541_v38 = vsub.f32 %v481_v52, %v536_v21  ;;  %v542_v44 = vsub.f32 %v482_v53, %v536_v21 }
 0x2dc   :  { %v543_v34 = vmul.f32 1.442695, %v539_v61  ;;  %v545_v43 = vmul.f32 1.442695, %v540_v26  ;;  %v547_v48 = vmul.f32 1.442695, %v541_v38  ;;  %v3255_v38 = vpack.c.bf16 %v649_v16, %v648_v4 }
 0x2dd   :  { %v549_v49 = vmul.f32 1.442695, %v542_v44 }
 0x2de   :  { %2793 = vpow2.f32 %v543_v34  ;;  %v650_v34 = vld [vmem:[%s3713_s6 + $0x10] sm:$0xff]  ;;  %2711 = vmatpush3.bf16.msra.mxu1 %v3255_v38 }
 0x2df   :  { %2795 = vpow2.f32 %v545_v43  ;;  %v651_v43 = vld [vmem:[%s3713_s6 + $0x18] sm:$0xff]  ;;  %2712 = vmatprep.subr.bf16.mxu1 %v2928_v1 }
 0x2e0   :  { %2797 = vpow2.f32 %v547_v48  ;;  %v3261_v44 = vpack.c.bf16 %v651_v43, %v650_v34 }
 0x2e1   :  { %2799 = vpow2.f32 %v549_v49 }
 0x2e2   :  { %2714 = vmatpush3.bf16.msra.mxu1 %v3261_v44 }
 0x2e3   :  { %2721 = vmatprep.subr.bf16.mxu1 %v2928_v1 }
 0x2e8   :  { %v2794_v50 = vpop.eup %2793 }
 0x2e9   :  { %556 = vperm.xlu0 %2768, %v2794_v50   ;;  %v2796_v51 = vpop.eup %2795 }
 0x2ea   :  { %v2798_v54 = vpop.eup %2797 }
 0x2eb   :  { %v2800_v55 = vpop.eup %2799 }
 0x2ed   :  { %559 = vperm.xlu0 %2768, %v2796_v51  }
 0x2f1   :  { %562 = vperm.xlu0 %2768, %v2798_v54  }
 0x2f5   :  { %565 = vperm.xlu0 %2768, %v2800_v55  }
 0x368   :  { %v557_v42 = vpop.permute.xlu0 %556 }
 0x369   :  { %v570_v53 = vrot.slane %v557_v42, %v3217_v18 }
 0x36c   :  { %v560_v46 = vpop.permute.xlu0 %559 }
 0x36d   :  { %v574_v52 = vrot.slane %v560_v46, %v3214_v13 }
 0x36f   :  { %v575_v11 = vsel %vm510_vm14, %v574_v52, %v570_v53 }
 0x370   :  { %v563_v56 = vpop.permute.xlu0 %562 }
 0x371   :  { %v579_v15 = vrot.slane %v563_v56, %v3217_v18 }
 0x374   :  { %v566_v12 = vpop.permute.xlu0 %565 }
 0x375   :  { %v583_v47 = vrot.slane %v566_v12, %v3214_v13 }
 0x377   :  { %v584_v29 = vsel %vm510_vm14, %v583_v47, %v579_v15 }
 0x378   :  { %v585_v30 = vsel %vm521_vm15, %v584_v29, %v575_v11 }
 0x379   :  { %v587_v0 = vsel %vm524_vm3, %v585_v30, 0.0 }
 0x37a   :  { %588 = vadd.xlane.f32.xlu0 %v587_v0 }
 0x390   :  { %749 = vrot.lane.b32.xlu0 %v748_v33, %s2933_s3 }
 0x407   :  { %v589_v36 = vpop.xlane.xlu0 %588 }
 0x408   :  { %2801 = vrcp.f32 %v589_v36 }
 0x40b   :  { %v750_v43 = vpop.permute.xlu0 %749 }
 0x412   :  { %v2802_v6 = vpop.eup %2801 }
 0x413   :  { %v595_v58 = vrot.slane %v2802_v6, %v3133_v57  ;;  %v599_v61 = vrot.slane %v2802_v6, %v3203_v39 }
 0x415   :  { %v602_v59 = vmul.f32 %v2794_v50, %v595_v58  ;;  %v603_v21 = vmul.f32 %v2796_v51, %v595_v58  ;;  %v604_v26 = vmul.f32 %v2798_v54, %v599_v61  ;;  %v605_v60 = vmul.f32 %v2800_v55, %v599_v61 }
 0x417   :  { %608 = vperm.xlu1 %2769, %v602_v59  }
 0x41b   :  { %613 = vperm.xlu1 %2769, %v603_v21  }
 0x41f   :  { %618 = vperm.xlu1 %2769, %v604_v26  }
 0x423   :  { %623 = vperm.xlu1 %2769, %v605_v60   ;;  %v3297_v60 = vld [vmem:[%s3714_s7] ss:$0 sm:$0xff] }
 0x427   :  { %759 = vrot.lane.b32.xlu1 %v748_v33, %s2934_s10 }
 0x496   :  { %v3266_v48 = vpop.permute.xlu1 %608 }
 0x497   :  { %v626_v49 = vmul.f32 %v3266_v48, %v3093_v32 }
 0x499   :  { %v630_v54 = vsel %vm79_vm1, %v626_v49, 0.0 }
 0x49a   :  { %v3270_v50 = vpop.permute.xlu1 %613 }
 0x49b   :  { %v627_v51 = vmul.f32 %v3270_v50, %v3108_v37 }
 0x49d   :  { %v631_v55 = vsel %vm79_vm1, %v627_v51, 0.0 }
 0x49e   :  { %v632_v42 = vadd.f32 %v631_v55, %v630_v54  ;;  %v3276_v46 = vpop.permute.xlu1 %618 }
 0x49f   :  { %v628_v52 = vmul.f32 %v3276_v46, %v3101_v35 }
 0x4a0   :  { %v633_v56 = vrot.slane %v632_v42, 4 }
 0x4a1   :  { %v639_v47 = vsel %vm79_vm1, %v628_v52, 0.0 }
 0x4a2   :  { %v634_v12 = vadd.f32 %v633_v56, %v632_v42  ;;  %v3280_v53 = vpop.permute.xlu1 %623 }
 0x4a3   :  { %v629_v15 = vmul.f32 %v3280_v53, %v3117_v41 }
 0x4a4   :  { %v635_v29 = vrot.slane %v634_v12, 2 }
 0x4a5   :  { %v640_v11 = vsel %vm79_vm1, %v629_v15, 0.0 }
 0x4a6   :  { %v641_v30 = vadd.f32 %v640_v11, %v639_v47  ;;  %v636_v33 = vadd.f32 %v635_v29, %v634_v12  ;;  %v760_v56 = vpop.permute.xlu1 %759  ;;  %v775_v47 = vcombine.low %v3063_v20, %v3076_v25 }
 0x4a8   :  { %v642_v0 = vrot.slane %v641_v30, 4  ;;  %v637_v6 = vrot.slane %v636_v33, 1  ;;  %v782_v11 = vrot.slane %v775_v47, %v3036_v8 }
 0x4aa   :  { %v643_v3 = vadd.f32 %v642_v0, %v641_v30  ;;  %v638_v21 = vadd.f32 %v637_v6, %v636_v33  ;;  %v795_v30 = vld [vmem:[%s3715_s8] sm:$0xff]  ;;  %v796_v0 = vld [vmem:[%s3715_s8 + $0x8] sm:$0xff]  ;;  %v789_v33 = vrot.slane %v782_v11, %v3036_v8 }
 0x4ab   :  { %v2716_v25 = vpack.c.bf16 %v796_v0, %v795_v30 }
 0x4ac   :  { %v644_v36 = vrot.slane %v643_v3, 2 }
 0x4ad   :  { %2717 = vmatpush3.bf16.msra.mxu0 %v2716_v25 }
 0x4ae   :  { %v645_v58 = vadd.f32 %v644_v36, %v643_v3  ;;  %v797_v3 = vld [vmem:[%s3715_s8 + $0x10] sm:$0xff]  ;;  %v798_v36 = vld [vmem:[%s3715_s8 + $0x18] sm:$0xff]  ;;  %2718 = vmatprep.subr.bf16.mxu0 %v2928_v1 }
 0x4af   :  { %v2719_v6 = vpack.c.bf16 %v798_v36, %v797_v3 }
 0x4b0   :  { %v646_v59 = vrot.slane %v645_v58, 1 }
 0x4b1   :  { %2720 = vmatpush3.bf16.msra.mxu0 %v2719_v6 }
 0x4b2   :  { %v647_v61 = vadd.f32 %v646_v59, %v645_v58  ;;  %2727 = vmatprep.subr.bf16.mxu0 %v2928_v1  ;;  %v207_v58 = vcombine.high %v3053_v14, %v3053_v14 }
 0x4b4   :  { %v661_v26 = vsel %vm521_vm15, %v647_v61, %v638_v21  ;;  %v3324_v59 = vrot.slane %v207_v58, %v3036_v8  ;;  %v989_v61 = vmul.f32 %v3066_v22, %v3069_v23 }
 0x4b5   :  { %2627 = vmatmul.mubr.msk.f32.vlgmr.msra.gmra.mrb[0].mxu1 %vm79_vm1, %v661_v26 }
 0x4b6   :  { %2723 = vmatpush3.bf16.msra.mxu1 %v3255_v38  ;;  %2648 = vmatprep.mubr.msk.f32.mxu1 %vm2929_vm0, %v2930_v2  ;;  %v3328_v21 = vrot.slane %v3324_v59, %v3036_v8 }
 0x4b7   :  { %2724 = vmatprep.subr.bf16.mxu1 %v2928_v1 }
 0x4b8   :  { %v990_v26 = vmul.f32 %v3072_v24, %v3328_v21 }
 0x4ba   :  { %2726 = vmatpush3.bf16.msra.mxu1 %v3261_v44 }
 0x4bb   :  { %2733 = vmatprep.subr.bf16.mxu1 %v2928_v1 }
 0x588   :  { %v730_v4 = vpop.f32.mrb[0].mxu1 }
 0x589   :  { %v731_v16 = vadd.f32 %v3297_v60, %v730_v4  ;;  %v2628_v34 = vpop.f32.mrb[1].mxu1  ;;  %v993_v4 = vcombine.low %v989_v61, %v990_v26  ;;  %v1040_v61 = vrot.slane %v1033_v17, %v3036_v8 }
 0x58b   :  { %v752_v49 = vadd.f32 %v750_v43, %v731_v16  ;;  %v1000_v34 = vrot.slane %v993_v4, %v3036_v8  ;;  %v1047_v26 = vrot.slane %v1040_v61, %v3036_v8 }
 0x58d   :  { %v2547_v51 = vmul.f32 -1.442695, %v752_v49  ;;  %v1007_v43 = vrot.slane %v1000_v34, %v3036_v8  ;;  %v1049_v4 = vsel %vm310_vm2, %v1047_v26, 0.0 }
 0x58f   :  { %2803 = vpow2.f32 %v2547_v51  ;;  %v1009_v51 = vsel %vm310_vm2, %v1007_v43, 0.0 }
 0x590   :  { %1010 = vadd.xlane.f32.xlu0 %v1009_v51 }
 0x599   :  { %v2804_v54 = vpop.eup %2803 }
 0x59a   :  { %v756_v55 = vadd.f32 1.0, %v2804_v54 }
 0x59c   :  { %2805 = vrcp.f32 %v756_v55 }
 0x5a6   :  { %v2806_v42 = vpop.eup %2805 }
 0x5a7   :  { %v762_v52 = vmul.f32 %v2806_v42, %v760_v56  ;;  %v769_v14 = vsub.f32 1.0, %v2806_v42 }
 0x5a9   :  { %764 = vrot.lane.b32.xlu1 %v762_v52, %s2935_s21 }
 0x61b   :  { %v765_v12 = vpop.permute.xlu1 %764 }
 0x61c   :  { %v767_v15 = vadd.f32 %v765_v12, %v731_v16 }
 0x61e   :  { %2807 = vtanh.f32 %v767_v15 }
 0x628   :  { %v2808_v29 = vpop.eup %2807 }
 0x629   :  { %771 = vrot.lane.b32.xlu1 %v2808_v29, %s2933_s3 }
 0x62d   :  { %790 = vrot.lane.b32.xlu1 %v789_v33, %s2934_s10 }
 0x69b   :  { %v772_v16 = vpop.permute.xlu1 %771 }
 0x69c   :  { %v774_v54 = vmul.f32 %v772_v16, %v769_v14  ;;  %v1011_v14 = vpop.xlane.xlu0 %1010 }
 0x69f   :  { %v791_v49 = vpop.permute.xlu1 %790 }
 0x6a0   :  { %v793_v55 = vmul.f32 %v2806_v42, %v791_v49  ;;  %v3349_v42 = vld [vmem:[%s3716_s9] ss:$0 sm:$0xff]  ;;  %v3372_v49 = vadd.f32 %v3122_v45, %v1011_v14 }
 0x6a2   :  { %v3337_v56 = vadd.f32 %v793_v55, %v774_v54  ;;  %v1014_v54 = vand.u32 2147483647, %v3372_v49 }
 0x6a4   :  { %807 = vrot.lane.b32.xlu1 %v3337_v56, %s2933_s3  ;;  %v1015_v7 = vsub.f32 0.0, %v1014_v54 }
 0x6a6   :  { %v1016_v55 = vmul.f32 1.442695, %v1015_v7 }
 0x716   :  { %v808_v52 = vpop.permute.xlu1 %807 }
 0x717   :  { %2638 = vmatmul.mubr.msk.f32.vlgmr.msra.gmra.mrb[2].mxu0 %vm79_vm1, %v808_v52 }
 0x718   :  { %2729 = vmatpush3.bf16.msra.mxu0 %v2716_v25  ;;  %2659 = vmatprep.mubr.msk.f32.mxu0 %vm2929_vm0, %v2930_v2 }
 0x719   :  { %2730 = vmatprep.subr.bf16.mxu0 %v2928_v1 }
 0x71c   :  { %2732 = vmatpush3.bf16.msra.mxu0 %v2719_v6 }
 0x71d   :  { %2739 = vmatprep.subr.bf16.mxu0 %v2928_v1 }
 0x7ea   :  { %v877_v12 = vpop.f32.mrb[2].mxu0 }
 0x7eb   :  { %v878_v15 = vadd.f32 %v3349_v42, %v877_v12  ;;  %v2639_v47 = vpop.f32.mrb[3].mxu0 }
 0x7ed   :  { %v939_v11 = vrot.slane %v878_v15, %v3036_v8  ;;  %v2550_v16 = vmul.f32 -1.442695, %v878_v15 }
 0x7ef   :  { %v940_v29 = vcombine.high %v939_v11, %v939_v11  ;;  %v947_v30 = vrot.slane %v939_v11, %v3036_v8  ;;  %2809 = vpow2.f32 %v2550_v16 }
 0x7f1   :  { %v958_v0 = vrot.slane %v947_v30, %v3133_v57  ;;  %v954_v3 = vrot.slane %v940_v29, %v3036_v8 }
 0x7f3   :  { %v965_v33 = vmul.f32 %v958_v0, %v3266_v48  ;;  %v966_v25 = vmul.f32 %v958_v0, %v3270_v50  ;;  %v962_v36 = vrot.slane %v954_v3, %v3133_v57 }
 0x7f5   :  { %973 = vrot.lane.b32.xlu1 %v965_v33, %s2933_s3  ;;  %v967_v6 = vmul.f32 %v962_v36, %v3276_v46  ;;  %v968_v58 = vmul.f32 %v962_v36, %v3280_v53 }
 0x7f9   :  { %975 = vrot.lane.b32.xlu1 %v966_v25, %s2933_s3  ;;  %v2810_v34 = vpop.eup %2809 }
 0x7fa   :  { %v884_v43 = vadd.f32 1.0, %v2810_v34 }
 0x7fc   :  { %2811 = vrcp.f32 %v884_v43 }
 0x7fd   :  { %977 = vrot.lane.b32.xlu1 %v967_v6, %s2933_s3  ;;  %2813 = vpow2.f32 %v1016_v55 }
 0x801   :  { %979 = vrot.lane.b32.xlu1 %v968_v58, %s2933_s3 }
 0x806   :  { %v2812_v51 = vpop.eup %2811 }
 0x807   :  { %v894_v5 = vrot.slane %v2812_v51, %v3036_v8  ;;  %v2814_v30 = vpop.eup %2813 }
 0x808   :  { %v1018_v6 = vadd.f32 1.0, %v2814_v30  ;;  %v1021_v51 = vmul.f32 -0.5, %v2814_v30 }
 0x809   :  { %v902_v17 = vrot.slane %v894_v5, %v3036_v8  ;;  %v895_v12 = vcombine.high %v894_v5, %v894_v5 }
 0x80a   :  { %2815 = vlog2.f32 %v1018_v6 }
 0x80b   :  { %v913_v52 = vrot.slane %v902_v17, %v3133_v57  ;;  %v909_v47 = vrot.slane %v895_v12, %v3036_v8  ;;  %v1022_v12 = vadd.f32 1.0, %v1021_v51 }
 0x80d   :  { %v920_v15 = vmul.f32 %v913_v52, %v3266_v48  ;;  %v921_v45 = vmul.f32 %v913_v52, %v3270_v50  ;;  %v917_v29 = vrot.slane %v909_v47, %v3133_v57 }
 0x80f   :  { %v924_v11 = vsub.f32 1.0, %v920_v15  ;;  %v925_v3 = vsub.f32 1.0, %v921_v45  ;;  %v922_v33 = vmul.f32 %v917_v29, %v3276_v46  ;;  %v923_v50 = vmul.f32 %v917_v29, %v3280_v53 }
 0x810   :  { %v1066_v53 = vrot.slane %v3140_v62, %v3133_v57 }
 0x811   :  { %v928_v0 = vmul.f32 %v924_v11, %v3093_v32  ;;  %v929_v58 = vmul.f32 %v925_v3, %v3108_v37  ;;  %v926_v61 = vsub.f32 1.0, %v922_v33  ;;  %v927_v34 = vsub.f32 1.0, %v923_v50 }
 0x812   :  { %v1024_v11 = vand.u32 2147483647, %v2814_v30  ;;  %v1023_v3 = vmul.f32 %v2814_v30, %v1022_v12  ;;  %v1013_v33 = vmax.f32 %v3372_v49, 0.0 }
 0x813   :  { %v930_v46 = vmul.f32 %v926_v61, %v3101_v35  ;;  %v931_v54 = vmul.f32 %v927_v34, %v3117_v41  ;;  %v1062_v41 = vrot.slane %v3143_v63, %v3133_v57 }
 0x814   :  { %v2816_v15 = vpop.eup %2815  ;;  %vm1025_vm4 = vcmp.lt.f32.partialorder %v1024_v11, 0.0004427343 }
 0x825   :  { %1050 = vadd.xlane.f32.xlu1 %v1049_v4 }
 0x867   :  { %v974_v25 = vpop.permute.xlu1 %973 }
 0x868   :  { %v3384_v36 = vadd.f32 %v974_v25, %v928_v0  ;;  %v1020_v0 = vmul.f32 0.6931472, %v2816_v15 }
 0x86a   :  { %v1085_v48 = vmul.f32 %v3384_v36, %v3384_v36  ;;  %v1069_v29 = vmul.f32 %v1062_v41, %v3384_v36 }
 0x86b   :  { %v976_v26 = vpop.permute.xlu1 %975 }
 0x86c   :  { %v3390_v4 = vadd.f32 %v976_v26, %v929_v58  ;;  %v1089_v32 = vsel %vm79_vm1, %v1085_v48, 0.0  ;;  %v1073_v25 = vsel %vm79_vm1, %v1069_v29, 0.0  ;;  %v1026_v58 = vsel %vm1025_vm4, %v1023_v3, %v1020_v0 }
 0x86d   :  { %1090 = vadd.xlane.f32.xlu0 %v1089_v32  ;;  %v1027_v50 = vadd.f32 %v1026_v58, %v1013_v33 }
 0x86e   :  { %v1086_v16 = vmul.f32 %v3390_v4, %v3390_v4  ;;  %v1070_v6 = vmul.f32 %v1062_v41, %v3390_v4 }
 0x86f   :  { %v978_v37 = vpop.permute.xlu1 %977  ;;  %v1028_v32 = vadd.f32 1.0, %v1027_v50 }
 0x870   :  { %v3396_v43 = vadd.f32 %v978_v37, %v930_v46  ;;  %v1092_v14 = vsel %vm79_vm1, %v1086_v16, 0.0  ;;  %v1076_v48 = vsel %vm79_vm1, %v1070_v6, 0.0 }
 0x871   :  { %1093 = vadd.xlane.f32.xlu0 %v1092_v14 }
 0x872   :  { %v1087_v5 = vmul.f32 %v3396_v43, %v3396_v43  ;;  %v1071_v35 = vmul.f32 %v1066_v53, %v3396_v43 }
 0x873   :  { %v980_v7 = vpop.permute.xlu1 %979 }
 0x874   :  { %v3405_v17 = vadd.f32 %v980_v7, %v931_v54  ;;  %v1095_v55 = vsel %vm79_vm1, %v1087_v5, 0.0  ;;  %v1079_v52 = vsel %vm79_vm1, %v1071_v35, 0.0 }
 0x875   :  { %1096 = vadd.xlane.f32.xlu0 %v1095_v55  ;;  %1080 = vadd.xlane.f32.xlu1 %v1079_v52 }
 0x876   :  { %v1088_v47 = vmul.f32 %v3405_v17, %v3405_v17  ;;  %v1072_v61 = vmul.f32 %v1066_v53, %v3405_v17 }
 0x878   :  { %v1098_v45 = vsel %vm79_vm1, %v1088_v47, 0.0  ;;  %v1082_v26 = vsel %vm79_vm1, %v1072_v61, 0.0 }
 0x879   :  { %1099 = vadd.xlane.f32.xlu0 %v1098_v45 }
 0x87d   :  { %1074 = vadd.xlane.f32.xlu0 %v1073_v25 }
 0x881   :  { %1077 = vadd.xlane.f32.xlu0 %v1076_v48 }
 0x885   :  { %1083 = vadd.xlane.f32.xlu0 %v1082_v26 }
 0x886   :  { %1158 = vperm.xlu1 %2769, %v1028_v32  }
 0x8b2   :  { %v1051_v30 = vpop.xlane.xlu1 %1050 }
 0x8b3   :  { %2817 = vrsqrt.f32 %v1051_v30  ;;  %vm1054_vm5 = vcmp.eq.f32.partialorder %v1051_v30, inf  ;;  %v1057_v51 = vand.u32 2147483648, %v1051_v30  ;;  %vm1056_vm6 = vcmp.eq.f32.partialorder %v1051_v30, 0.0 }
 0x8bd   :  { %v2818_v46 = vpop.eup %2817 }
 0x8be   :  { %v1053_v16 = vmul.f32 %v2818_v46, %v1051_v30 }
 0x8c0   :  { %v1055_v37 = vsel %vm1054_vm5, %v1051_v30, %v1053_v16  ;;  %vm2221_vm5 = vcmask 1040384  }
 0x8c1   :  { %v1058_v54 = vsel %vm1056_vm6, %v1057_v51, %v1055_v37 }
 0x8c2   :  { %v1133_v52 = vrot.slane %v1058_v54, %v3133_v57  ;;  %v1137_v48 = vrot.slane %v1058_v54, %v3203_v39 }
 0x8fa   :  { %v1091_v49 = vpop.xlane.xlu0 %1090 }
 0x8fb   :  { %2819 = vrsqrt.f32 %v1091_v49  ;;  %vm1103_vm7 = vcmp.eq.f32.partialorder %v1091_v49, inf  ;;  %v1106_v7 = vand.u32 2147483648, %v1091_v49  ;;  %vm1105_vm8 = vcmp.eq.f32.partialorder %v1091_v49, 0.0 }
 0x8fe   :  { %v1094_v34 = vpop.xlane.xlu0 %1093 }
 0x8ff   :  { %2821 = vrsqrt.f32 %v1094_v34  ;;  %vm1110_vm9 = vcmp.eq.f32.partialorder %v1094_v34, inf  ;;  %v1113_v11 = vand.u32 2147483648, %v1094_v34  ;;  %vm1112_vm10 = vcmp.eq.f32.partialorder %v1094_v34, 0.0 }
 0x902   :  { %v1097_v14 = vpop.xlane.xlu0 %1096  ;;  %v1081_v61 = vpop.xlane.xlu1 %1080 }
 0x903   :  { %2823 = vrsqrt.f32 %v1097_v14  ;;  %vm1117_vm11 = vcmp.eq.f32.partialorder %v1097_v14, inf  ;;  %v1120_v6 = vand.u32 2147483648, %v1097_v14  ;;  %vm1119_vm12 = vcmp.eq.f32.partialorder %v1097_v14, 0.0 }
 0x905   :  { %v2820_v53 = vpop.eup %2819 }
 0x906   :  { %v1102_v5 = vmul.f32 %v2820_v53, %v1091_v49  ;;  %v1100_v35 = vpop.xlane.xlu0 %1099  ;;  %v1159_v51 = vpop.permute.xlu1 %1158 }
 0x907   :  { %2825 = vrsqrt.f32 %v1100_v35  ;;  %vm1124_vm13 = vcmp.eq.f32.partialorder %v1100_v35, inf  ;;  %v1127_v46 = vand.u32 2147483648, %v1100_v35  ;;  %vm1126_vm4 = vcmp.eq.f32.partialorder %v1100_v35, 0.0 }
 0x908   :  { %v1104_v55 = vsel %vm1103_vm7, %v1091_v49, %v1102_v5  ;;  %v1163_v54 = vrot.slane %v1159_v51, %v3133_v57 }
 0x909   :  { %v2822_v12 = vpop.eup %2821  ;;  %v1107_v15 = vsel %vm1105_vm8, %v1106_v7, %v1104_v55 }
 0x90a   :  { %v1109_v47 = vmul.f32 %v2822_v12, %v1094_v34  ;;  %v1140_v41 = vmul.f32 %v1133_v52, %v1107_v15  ;;  %v1075_v53 = vpop.xlane.xlu0 %1074 }
 0x90c   :  { %v1111_v45 = vsel %vm1110_vm9, %v1094_v34, %v1109_v47  ;;  %v1144_v29 = vmax.f32 %v1140_v41, 1e-08 }
 0x90d   :  { %v2824_v0 = vpop.eup %2823  ;;  %v1114_v3 = vsel %vm1112_vm10, %v1113_v11, %v1111_v45 }
 0x90e   :  { %v1116_v33 = vmul.f32 %v2824_v0, %v1097_v14  ;;  %2827 = vrcp.f32 %v1144_v29  ;;  %v1141_v25 = vmul.f32 %v1133_v52, %v1114_v3  ;;  %v1078_v15 = vpop.xlane.xlu0 %1077 }
 0x910   :  { %v1118_v58 = vsel %vm1117_vm11, %v1097_v14, %v1116_v33  ;;  %v1145_v50 = vmax.f32 %v1141_v25, 1e-08 }
 0x911   :  { %v2826_v26 = vpop.eup %2825  ;;  %v1121_v32 = vsel %vm1119_vm12, %v1120_v6, %v1118_v58 }
 0x912   :  { %v1142_v30 = vmul.f32 %v1137_v48, %v1121_v32  ;;  %v1123_v49 = vmul.f32 %v2826_v26, %v1100_v35  ;;  %2829 = vrcp.f32 %v1145_v50  ;;  %v1084_v3 = vpop.xlane.xlu0 %1083 }
 0x914   :  { %v1146_v16 = vmax.f32 %v1142_v30, 1e-08  ;;  %v1125_v34 = vsel %vm1124_vm13, %v1100_v35, %v1123_v49  ;;  %v1167_v35 = vrot.slane %v1159_v51, %v3203_v39 }
 0x915   :  { %v1128_v37 = vsel %vm1126_vm4, %v1127_v46, %v1125_v34 }
 0x916   :  { %2831 = vrcp.f32 %v1146_v16  ;;  %v1143_v5 = vmul.f32 %v1137_v48, %v1128_v37 }
 0x918   :  { %v2828_v14 = vpop.eup %2827  ;;  %v1147_v7 = vmax.f32 %v1143_v5, 1e-08 }
 0x919   :  { %v1152_v55 = vmul.f32 %v2828_v14, %v1075_v53 }
 0x91a   :  { %2833 = vrcp.f32 %v1147_v7 }
 0x91b   :  { %v1170_v52 = vmul.f32 %v1163_v54, %v1152_v55 }
 0x91c   :  { %v2830_v12 = vpop.eup %2829 }
 0x91d   :  { %v1153_v47 = vmul.f32 %v2830_v12, %v1078_v15  ;;  %1179 = vperm.xlu0 %2768, %v1170_v52  }
 0x91f   :  { %v1171_v41 = vmul.f32 %v1163_v54, %v1153_v47 }
 0x920   :  { %v2832_v11 = vpop.eup %2831 }
 0x921   :  { %v1154_v45 = vmul.f32 %v2832_v11, %v1081_v61  ;;  %1182 = vperm.xlu1 %2769, %v1171_v41  }
 0x923   :  { %v1172_v29 = vmul.f32 %v1167_v35, %v1154_v45 }
 0x924   :  { %v2834_v0 = vpop.eup %2833 }
 0x925   :  { %v1155_v33 = vmul.f32 %v2834_v0, %v1084_v3  ;;  %1185 = vperm.xlu1 %2769, %v1172_v29  }
 0x927   :  { %v1173_v25 = vmul.f32 %v1167_v35, %v1155_v33 }
 0x929   :  { %1188 = vperm.xlu0 %2768, %v1173_v25  }
 0x99c   :  { %v1180_v58 = vpop.permute.xlu0 %1179 }
 0x99d   :  { %v1193_v32 = vrot.slane %v1180_v58, %v3217_v18 }
 0x9a0   :  { %v1183_v6 = vpop.permute.xlu1 %1182 }
 0x9a1   :  { %v1197_v50 = vrot.slane %v1183_v6, %v3214_v13 }
 0x9a3   :  { %v1198_v49 = vsel %vm510_vm14, %v1197_v50, %v1193_v32 }
 0x9a4   :  { %v1186_v48 = vpop.permute.xlu1 %1185 }
 0x9a5   :  { %v1202_v61 = vrot.slane %v1186_v48, %v3217_v18 }
 0x9a8   :  { %v1189_v26 = vpop.permute.xlu0 %1188 }
 0x9a9   :  { %v1206_v30 = vrot.slane %v1189_v26, %v3214_v13 }
 0x9ab   :  { %v1207_v46 = vsel %vm510_vm14, %v1206_v30, %v1202_v61 }
 0x9ac   :  { %v1208_v16 = vsel %vm521_vm15, %v1207_v46, %v1198_v49 }
 0x9ad   :  { %v1210_v34 = vsel %vm524_vm3, %v1208_v16, -inf }
 0x9ae   :  { %1211 = vmax.xlane.f32.xlu1 %v1210_v34 }
 0xa3b   :  { %v1212_v37 = vpop.xlane.xlu1 %1211 }
 0xa3c   :  { %v1217_v51 = vrot.slane %v1212_v37, %v3133_v57  ;;  %v1221_v53 = vrot.slane %v1212_v37, %v3203_v39 }
 0xa3e   :  { %v1224_v5 = vsub.f32 %v1170_v52, %v1217_v51  ;;  %v1225_v14 = vsub.f32 %v1171_v41, %v1217_v51  ;;  %v1226_v54 = vsub.f32 %v1172_v29, %v1221_v53  ;;  %v1227_v12 = vsub.f32 %v1173_v25, %v1221_v53 }
 0xa3f   :  { %v1415_v53 = vrot.slane %v1408_v19, %v3036_v8 }
 0xa40   :  { %v1228_v7 = vmul.f32 1.442695, %v1224_v5  ;;  %v1230_v55 = vmul.f32 1.442695, %v1225_v14  ;;  %v1232_v15 = vmul.f32 1.442695, %v1226_v54 }
 0xa41   :  { %v1234_v47 = vmul.f32 1.442695, %v1227_v12  ;;  %v1422_v5 = vrot.slane %v1415_v53, %v3036_v8 }
 0xa42   :  { %2835 = vpow2.f32 %v1228_v7 }
 0xa43   :  { %2837 = vpow2.f32 %v1230_v55 }
 0xa44   :  { %2839 = vpow2.f32 %v1232_v15 }
 0xa45   :  { %2841 = vpow2.f32 %v1234_v47 }
 0xa4c   :  { %v2836_v11 = vpop.eup %2835 }
 0xa4d   :  { %1241 = vperm.xlu0 %2768, %v2836_v11   ;;  %v2838_v45 = vpop.eup %2837 }
 0xa4e   :  { %v2840_v35 = vpop.eup %2839 }
 0xa4f   :  { %v2842_v0 = vpop.eup %2841 }
 0xa51   :  { %1244 = vperm.xlu0 %2768, %v2838_v45  }
 0xa55   :  { %1247 = vperm.xlu0 %2768, %v2840_v35  }
 0xa59   :  { %1250 = vperm.xlu0 %2768, %v2842_v0  }
 0xacc   :  { %v1242_v52 = vpop.permute.xlu0 %1241 }
 0xacd   :  { %v1255_v25 = vrot.slane %v1242_v52, %v3217_v18 }
 0xad0   :  { %v1245_v41 = vpop.permute.xlu0 %1244 }
 0xad1   :  { %v1259_v29 = vrot.slane %v1245_v41, %v3214_v13 }
 0xad3   :  { %v1260_v48 = vsel %vm510_vm14, %v1259_v29, %v1255_v25 }
 0xad4   :  { %v1248_v3 = vpop.permute.xlu0 %1247 }
 0xad5   :  { %v1264_v6 = vrot.slane %v1248_v3, %v3217_v18 }
 0xad8   :  { %v1251_v33 = vpop.permute.xlu0 %1250 }
 0xad9   :  { %v1268_v58 = vrot.slane %v1251_v33, %v3214_v13 }
 0xadb   :  { %v1269_v50 = vsel %vm510_vm14, %v1268_v58, %v1264_v6 }
 0xadc   :  { %v1270_v26 = vsel %vm521_vm15, %v1269_v50, %v1260_v48 }
 0xadd   :  { %v1272_v32 = vsel %vm524_vm3, %v1270_v26, 0.0 }
 0xade   :  { %1273 = vadd.xlane.f32.xlu0 %v1272_v32 }
 0xb6b   :  { %v1274_v61 = vpop.xlane.xlu0 %1273 }
 0xb6c   :  { %2843 = vrcp.f32 %v1274_v61 }
 0xb76   :  { %v2844_v30 = vpop.eup %2843 }
 0xb77   :  { %v1280_v49 = vrot.slane %v2844_v30, %v3133_v57  ;;  %v1284_v34 = vrot.slane %v2844_v30, %v3203_v39 }
 0xb79   :  { %v1288_v46 = vmul.f32 %v2838_v45, %v1280_v49  ;;  %v1287_v16 = vmul.f32 %v2836_v11, %v1280_v49  ;;  %v1289_v37 = vmul.f32 %v2840_v35, %v1284_v34  ;;  %v1290_v51 = vmul.f32 %v2842_v0, %v1284_v34 }
 0xb7b   :  { %1298 = vperm.xlu0 %2768, %v1288_v46   ;;  %1293 = vperm.xlu1 %2769, %v1287_v16  }
 0xb7f   :  { %1303 = vperm.xlu1 %2769, %v1289_v37  }
 0xb83   :  { %1308 = vperm.xlu1 %2769, %v1290_v51  }
 0xb87   :  { %1423 = vrot.lane.b32.xlu1 %v1422_v5, %s2933_s3 }
 0xb8b   :  { %1433 = vrot.lane.b32.xlu1 %v1422_v5, %s2934_s10 }
 0xbfa   :  { %v3452_v14 = vpop.permute.xlu0 %1298  ;;  %v3454_v7 = vpop.permute.xlu1 %1293 }
 0xbfb   :  { %v1312_v54 = vmul.f32 %v3452_v14, %v3390_v4  ;;  %v1311_v55 = vmul.f32 %v3454_v7, %v3384_v36 }
 0xbfd   :  { %v1316_v62 = vsel %vm79_vm1, %v1312_v54, 0.0  ;;  %v1315_v63 = vsel %vm79_vm1, %v1311_v55, 0.0 }
 0xbfe   :  { %v1317_v19 = vadd.f32 %v1316_v62, %v1315_v63  ;;  %v3462_v12 = vpop.permute.xlu1 %1303 }
 0xbff   :  { %v1313_v47 = vmul.f32 %v3462_v12, %v3396_v43 }
 0xc00   :  { %v1318_v15 = vrot.slane %v1317_v19, 4 }
 0xc01   :  { %v1324_v0 = vsel %vm79_vm1, %v1313_v47, 0.0 }
 0xc02   :  { %v1319_v11 = vadd.f32 %v1318_v15, %v1317_v19  ;;  %v3466_v45 = vpop.permute.xlu1 %1308  ;;  %v3495_v15 = vcombine.high %v3063_v20, %v3063_v20  ;;  %v2138_v20 = vrot.slane %v3337_v56, %v3036_v8 }
 0xc03   :  { %v1314_v35 = vmul.f32 %v3466_v45, %v3405_v17 }
 0xc04   :  { %v1320_v41 = vrot.slane %v1319_v11, 2  ;;  %v1652_v47 = vmul.f32 %v3066_v22, %v3495_v15 }
 0xc05   :  { %v1325_v52 = vsel %vm79_vm1, %v1314_v35, 0.0 }
 0xc06   :  { %v1326_v3 = vadd.f32 %v1325_v52, %v1324_v0  ;;  %v1321_v33 = vadd.f32 %v1320_v41, %v1319_v11  ;;  %v1424_v16 = vpop.permute.xlu1 %1423 }
 0xc08   :  { %v1327_v29 = vrot.slane %v1326_v3, 4  ;;  %v1322_v48 = vrot.slane %v1321_v33, 1 }
 0xc0a   :  { %v1328_v25 = vadd.f32 %v1327_v29, %v1326_v3  ;;  %v1323_v26 = vadd.f32 %v1322_v48, %v1321_v33 }
 0xc0c   :  { %v1329_v6 = vrot.slane %v1328_v25, 2 }
 0xc0e   :  { %v1330_v58 = vadd.f32 %v1329_v6, %v1328_v25 }
 0xc10   :  { %v1331_v50 = vrot.slane %v1330_v58, 1 }
 0xc12   :  { %v1332_v32 = vadd.f32 %v1331_v50, %v1330_v58  ;;  %v2146_v50 = vrot.slane %v2138_v20, %v3036_v8 }
 0xc14   :  { %v1335_v61 = vsel %vm521_vm15, %v1332_v32, %v1323_v26 }
 0xc15   :  { %2649 = vmatmul.mubr.msk.f32.vlgmr.msra.gmra.mrb[2].mxu1 %vm79_vm1, %v1335_v61 }
 0xc16   :  { %2735 = vmatpush3.bf16.msra.mxu1 %v3255_v38  ;;  %2670 = vmatprep.mubr.msk.f32.mxu1 %vm2929_vm0, %v2930_v2  ;;  %v1449_v38 = vcombine.low %v3069_v23, %v3328_v21  ;;  %v223_v23 = vcombine.high %v3324_v59, %v3324_v59 }
 0xc17   :  { %2736 = vmatprep.subr.bf16.mxu1 %v2928_v1 }
 0xc18   :  { %v1456_v5 = vrot.slane %v1449_v38, %v3036_v8  ;;  %v3491_v21 = vrot.slane %v223_v23, %v3036_v8 }
 0xc1a   :  { %2738 = vmatpush3.bf16.msra.mxu1 %v3261_v44  ;;  %v1434_v44 = vpop.permute.xlu1 %1433  ;;  %v1653_v11 = vmul.f32 %v3072_v24, %v3491_v21  ;;  %v2139_v24 = vcombine.high %v2138_v20, %v2138_v20 }
 0xc1b   :  { %2745 = vmatprep.subr.bf16.mxu1 %v2928_v1 }
 0xc1c   :  { %v1656_v35 = vcombine.low %v1652_v47, %v1653_v11  ;;  %v2153_v61 = vrot.slane %v2139_v24, %v3036_v8 }
 0xc1e   :  { %v1663_v52 = vrot.slane %v1656_v35, %v3036_v8 }
 0xc20   :  { %v1670_v59 = vrot.slane %v1663_v52, %v3036_v8 }
 0xc22   :  { %v1672_v25 = vsel %vm310_vm2, %v1670_v59, 0.0 }
 0xce8   :  { %v1404_v30 = vpop.f32.mrb[2].mxu1 }
 0xce9   :  { %v1405_v49 = vadd.f32 %v3297_v60, %v1404_v30  ;;  %v2650_v46 = vpop.f32.mrb[3].mxu1  ;;  %v1463_v60 = vrot.slane %v1456_v5, %v3036_v8 }
 0xceb   :  { %v1426_v34 = vadd.f32 %v1424_v16, %v1405_v49 }
 0xced   :  { %v2552_v37 = vmul.f32 -1.442695, %v1426_v34 }
 0xcef   :  { %2845 = vpow2.f32 %v2552_v37 }
 0xcf9   :  { %v2846_v51 = vpop.eup %2845 }
 0xcfa   :  { %v1430_v53 = vadd.f32 1.0, %v2846_v51 }
 0xcfc   :  { %2847 = vrcp.f32 %v1430_v53 }
 0xd06   :  { %v2848_v54 = vpop.eup %2847 }
 0xd07   :  { %v1436_v55 = vmul.f32 %v2848_v54, %v1434_v44  ;;  %v1443_v41 = vsub.f32 1.0, %v2848_v54 }
 0xd09   :  { %1438 = vrot.lane.b32.xlu1 %v1436_v55, %s2935_s21 }
 0xd0d   :  { %1464 = vrot.lane.b32.xlu1 %v1463_v60, %s2934_s10 }
 0xd31   :  { %1673 = vadd.xlane.f32.xlu1 %v1672_v25 }
 0xd7b   :  { %v1439_v62 = vpop.permute.xlu1 %1438 }
 0xd7c   :  { %v1441_v63 = vadd.f32 %v1439_v62, %v1405_v49 }
 0xd7e   :  { %2849 = vtanh.f32 %v1441_v63  ;;  %v1703_v63 = vrot.slane %v1696_v31, %v3036_v8 }
 0xd7f   :  { %v1465_v0 = vpop.permute.xlu1 %1464 }
 0xd80   :  { %v1467_v29 = vmul.f32 %v2848_v54, %v1465_v0 }
 0xd88   :  { %v2850_v19 = vpop.eup %2849 }
 0xd89   :  { %1445 = vrot.lane.b32.xlu0 %v2850_v19, %s2933_s3  ;;  %v1710_v19 = vrot.slane %v1703_v63, %v3036_v8 }
 0xd8b   :  { %v1712_v23 = vsel %vm310_vm2, %v1710_v19, 0.0 }
 0xdbe   :  { %v1674_v0 = vpop.xlane.xlu1 %1673 }
 0xdfb   :  { %v1446_v3 = vpop.permute.xlu0 %1445 }
 0xdfc   :  { %v1448_v33 = vmul.f32 %v1446_v3, %v1443_v41  ;;  %v2899_v41 = vld [vmem:[#allocation2] ss:$0 sm:$0xff] }
 0xdfd   :  { %v3541_v3 = vadd.f32 %v2899_v41, %v1674_v0 }
 0xdfe   :  { %v1468_v6 = vadd.f32 %v1467_v29, %v1448_v33 }
 0xdff   :  { %v1677_v27 = vand.u32 2147483647, %v3541_v3 }
 0xe00   :  { %v2162_v22 = vrot.slane %v1468_v6, %v3036_v8  ;;  %1470 = vrot.lane.b32.xlu0 %v1468_v6, %s2933_s3 }
 0xe01   :  { %v1678_v31 = vsub.f32 0.0, %v1677_v27 }
 0xe02   :  { %v2163_v58 = vcombine.high %v2162_v22, %v2162_v22  ;;  %v2170_v48 = vrot.slane %v2162_v22, %v3036_v8 }
 0xe03   :  { %v1679_v25 = vmul.f32 1.442695, %v1678_v31 }
 0xe04   :  { %v2177_v26 = vrot.slane %v2163_v58, %v3036_v8  ;;  %v2204_v32 = vrot.slane %v2170_v48, %v3133_v57 }
 0xe06   :  { %v2208_v56 = vrot.slane %v2177_v26, %v3133_v57  ;;  %v3514_v30 = vsel %vm2221_vm5, %v2146_v50, %v2204_v32 }
 0xe08   :  { %v3516_v49 = vsel %vm2221_vm5, %v2153_v61, %v2208_v56  ;;  %v1725_v56 = vrot.slane %v3164_v10, %v3133_v57 }
 0xe72   :  { %v1471_v46 = vpop.permute.xlu0 %1470 }
 0xe73   :  { %2660 = vmatmul.mubr.msk.f32.vlgmr.msra.gmra.mrb[4].mxu0 %vm79_vm1, %v1471_v46 }
 0xe74   :  { %2681 = vmatprep.mubr.msk.f32.mxu0 %vm2929_vm0, %v2930_v2 }
 0xf46   :  { %v1540_v16 = vpop.f32.mrb[4].mxu0 }
 0xf47   :  { %v1541_v34 = vadd.f32 %v3349_v42, %v1540_v16  ;;  %v2661_v37 = vpop.f32.mrb[5].mxu0 }
 0xf49   :  { %v1602_v51 = vrot.slane %v1541_v34, %v3036_v8  ;;  %v2554_v47 = vmul.f32 -1.442695, %v1541_v34 }
 0xf4b   :  { %v1603_v53 = vcombine.high %v1602_v51, %v1602_v51  ;;  %v1610_v38 = vrot.slane %v1602_v51, %v3036_v8  ;;  %2851 = vpow2.f32 %v2554_v47 }
 0xf4d   :  { %v1621_v5 = vrot.slane %v1610_v38, %v3133_v57  ;;  %v1617_v54 = vrot.slane %v1603_v53, %v3036_v8 }
 0xf4f   :  { %v1628_v44 = vmul.f32 %v1621_v5, %v3454_v7  ;;  %v1629_v55 = vmul.f32 %v1621_v5, %v3452_v14  ;;  %v1625_v60 = vrot.slane %v1617_v54, %v3133_v57 }
 0xf51   :  { %1636 = vrot.lane.b32.xlu0 %v1628_v44, %s2933_s3  ;;  %v1630_v42 = vmul.f32 %v1625_v60, %v3462_v12  ;;  %v1631_v62 = vmul.f32 %v1625_v60, %v3466_v45  ;;  %v1729_v60 = vrot.slane %v3160_v9, %v3133_v57 }
 0xf55   :  { %1638 = vrot.lane.b32.xlu0 %v1629_v55, %s2933_s3  ;;  %v2852_v11 = vpop.eup %2851 }
 0xf56   :  { %v1547_v35 = vadd.f32 1.0, %v2852_v11 }
 0xf58   :  { %2853 = vrcp.f32 %v1547_v35 }
 0xf59   :  { %1640 = vrot.lane.b32.xlu0 %v1630_v42, %s2933_s3  ;;  %2855 = vpow2.f32 %v1679_v25  ;;  %v1676_v25 = vmax.f32 %v3541_v3, 0.0 }
 0xf5d   :  { %1642 = vrot.lane.b32.xlu0 %v1631_v62, %s2933_s3 }
 0xf62   :  { %v2854_v52 = vpop.eup %2853 }
 0xf63   :  { %v1557_v59 = vrot.slane %v2854_v52, %v3036_v8  ;;  %v2856_v46 = vpop.eup %2855 }
 0xf64   :  { %v1681_v38 = vadd.f32 1.0, %v2856_v46  ;;  %v1684_v35 = vmul.f32 -0.5, %v2856_v46 }
 0xf65   :  { %v1565_v28 = vrot.slane %v1557_v59, %v3036_v8  ;;  %v1558_v33 = vcombine.high %v1557_v59, %v1557_v59  ;;  %v1687_v59 = vand.u32 2147483647, %v2856_v46 }
 0xf66   :  { %2857 = vlog2.f32 %v1681_v38  ;;  %v1685_v52 = vadd.f32 1.0, %v1684_v35 }
 0xf67   :  { %v1576_v29 = vrot.slane %v1565_v28, %v3133_v57  ;;  %v1572_v6 = vrot.slane %v1558_v33, %v3036_v8  ;;  %vm1688_vm2 = vcmp.lt.f32.partialorder %v1687_v59, 0.0004427343 }
 0xf69   :  { %v1583_v20 = vmul.f32 %v1576_v29, %v3454_v7  ;;  %v1584_v24 = vmul.f32 %v1576_v29, %v3452_v14  ;;  %v1580_v58 = vrot.slane %v1572_v6, %v3133_v57  ;;  %v1686_v29 = vmul.f32 %v2856_v46, %v1685_v52 }
 0xf6b   :  { %v1587_v22 = vsub.f32 1.0, %v1583_v20  ;;  %v1588_v50 = vsub.f32 1.0, %v1584_v24  ;;  %v1585_v26 = vmul.f32 %v1580_v58, %v3462_v12  ;;  %v1586_v7 = vmul.f32 %v1580_v58, %v3466_v45 }
 0xf6d   :  { %v1591_v48 = vmul.f32 %v1587_v22, %v3384_v36  ;;  %v1592_v16 = vmul.f32 %v1588_v50, %v3390_v4  ;;  %v1589_v36 = vsub.f32 1.0, %v1585_v26  ;;  %v1590_v5 = vsub.f32 1.0, %v1586_v7 }
 0xf6f   :  { %v1593_v45 = vmul.f32 %v1589_v36, %v3396_v43  ;;  %v1594_v42 = vmul.f32 %v1590_v5, %v3405_v17 }
 0xf70   :  { %v2858_v41 = vpop.eup %2857 }
 0xf71   :  { %v1683_v31 = vmul.f32 0.6931472, %v2858_v41 }
 0xf73   :  { %v1689_v20 = vsel %vm1688_vm2, %v1686_v29, %v1683_v31  ;;  %vm2525_vm2 = vcmask 302080  }
 0xf74   :  { %v1690_v6 = vadd.f32 %v1689_v20, %v1676_v25 }
 0xf76   :  { %v1691_v22 = vadd.f32 1.0, %v1690_v6 }
 0xf7c   :  { %1713 = vadd.xlane.f32.xlu0 %v1712_v23 }
 0xfc3   :  { %v1637_v32 = vpop.permute.xlu0 %1636 }
 0xfc4   :  { %v3553_v61 = vadd.f32 %v1637_v32, %v1591_v48 }
 0xfc6   :  { %v1748_v14 = vmul.f32 %v3553_v61, %v3553_v61  ;;  %v1732_v34 = vmul.f32 %v1725_v56, %v3553_v61 }
 0xfc7   :  { %v1639_v37 = vpop.permute.xlu0 %1638 }
 0xfc8   :  { %v3562_v51 = vadd.f32 %v1639_v37, %v1592_v16  ;;  %v1752_v12 = vsel %vm79_vm1, %v1748_v14, 0.0  ;;  %v1736_v53 = vsel %vm79_vm1, %v1732_v34, 0.0 }
 0xfc9   :  { %1753 = vadd.xlane.f32.xlu1 %v1752_v12  ;;  %1737 = vadd.xlane.f32.xlu0 %v1736_v53 }
 0xfca   :  { %v1749_v4 = vmul.f32 %v3562_v51, %v3562_v51  ;;  %v1733_v0 = vmul.f32 %v1725_v56, %v3562_v51 }
 0xfcb   :  { %v1641_v54 = vpop.permute.xlu0 %1640 }
 0xfcc   :  { %v3569_v44 = vadd.f32 %v1641_v54, %v1593_v45  ;;  %v1755_v55 = vsel %vm79_vm1, %v1749_v4, 0.0  ;;  %v1739_v27 = vsel %vm79_vm1, %v1733_v0, 0.0 }
 0xfcd   :  { %1756 = vadd.xlane.f32.xlu1 %v1755_v55 }
 0xfce   :  { %v1750_v62 = vmul.f32 %v3569_v44, %v3569_v44  ;;  %v1734_v43 = vmul.f32 %v1729_v60, %v3569_v44 }
 0xfcf   :  { %v1643_v63 = vpop.permute.xlu0 %1642 }
 0xfd0   :  { %v3578_v19 = vadd.f32 %v1643_v63, %v1594_v42  ;;  %v1758_v23 = vsel %vm79_vm1, %v1750_v62, 0.0  ;;  %v1742_v47 = vsel %vm79_vm1, %v1734_v43, 0.0 }
 0xfd1   :  { %1759 = vadd.xlane.f32.xlu1 %v1758_v23  ;;  %1743 = vadd.xlane.f32.xlu0 %v1742_v47 }
 0xfd2   :  { %v1751_v11 = vmul.f32 %v3578_v19, %v3578_v19  ;;  %v1735_v28 = vmul.f32 %v1729_v60, %v3578_v19 }
 0xfd4   :  { %v1761_v17 = vsel %vm79_vm1, %v1751_v11, 0.0  ;;  %v1745_v33 = vsel %vm79_vm1, %v1735_v28, 0.0 }
 0xfd5   :  { %1762 = vadd.xlane.f32.xlu1 %v1761_v17 }
 0xfd9   :  { %1740 = vadd.xlane.f32.xlu1 %v1739_v27 }
 0xfdd   :  { %1746 = vadd.xlane.f32.xlu1 %v1745_v33 }
 0xfe7   :  { %1821 = vperm.xlu0 %2768, %v1691_v22  }
0x1009   :  { %v1714_v24 = vpop.xlane.xlu0 %1713 }
0x100a   :  { %2859 = vrsqrt.f32 %v1714_v24  ;;  %vm1717_vm6 = vcmp.eq.f32.partialorder %v1714_v24, inf  ;;  %v1720_v7 = vand.u32 2147483648, %v1714_v24  ;;  %vm1719_vm7 = vcmp.eq.f32.partialorder %v1714_v24, 0.0 }
0x1014   :  { %v2860_v48 = vpop.eup %2859 }
0x1015   :  { %v1716_v50 = vmul.f32 %v2860_v48, %v1714_v24 }
0x1017   :  { %v1718_v32 = vsel %vm1717_vm6, %v1714_v24, %v1716_v50  ;;  %vm2527_vm6 = vcmask 326656  }
0x1018   :  { %v1721_v46 = vsel %vm1719_vm7, %v1720_v7, %v1718_v32  ;;  %vm2529_vm7 = vcmask 457728  }
0x1019   :  { %v1796_v37 = vrot.slane %v1721_v46, %v3133_v57  ;;  %v1800_v47 = vrot.slane %v1721_v46, %v3203_v39 }
0x1056   :  { %v1754_v58 = vpop.xlane.xlu1 %1753  ;;  %v1738_v42 = vpop.xlane.xlu0 %1737 }
0x1057   :  { %2861 = vrsqrt.f32 %v1754_v58  ;;  %vm1766_vm8 = vcmp.eq.f32.partialorder %v1754_v58, inf  ;;  %v1769_v34 = vand.u32 2147483648, %v1754_v58  ;;  %vm1768_vm9 = vcmp.eq.f32.partialorder %v1754_v58, 0.0 }
0x105a   :  { %v1757_v26 = vpop.xlane.xlu1 %1756 }
0x105b   :  { %2863 = vrsqrt.f32 %v1757_v26  ;;  %vm1773_vm10 = vcmp.eq.f32.partialorder %v1757_v26, inf  ;;  %v1776_v4 = vand.u32 2147483648, %v1757_v26  ;;  %vm1775_vm11 = vcmp.eq.f32.partialorder %v1757_v26, 0.0 }
0x105e   :  { %v1760_v56 = vpop.xlane.xlu1 %1759  ;;  %v1744_v52 = vpop.xlane.xlu0 %1743 }
0x105f   :  { %2865 = vrsqrt.f32 %v1760_v56  ;;  %vm1780_vm12 = vcmp.eq.f32.partialorder %v1760_v56, inf  ;;  %v1783_v63 = vand.u32 2147483648, %v1760_v56  ;;  %vm1782_vm13 = vcmp.eq.f32.partialorder %v1760_v56, 0.0 }
0x1061   :  { %v2862_v3 = vpop.eup %2861 }
0x1062   :  { %v1765_v16 = vmul.f32 %v2862_v3, %v1754_v58  ;;  %v1763_v14 = vpop.xlane.xlu1 %1762 }
0x1063   :  { %2867 = vrsqrt.f32 %v1763_v14  ;;  %vm1787_vm4 = vcmp.eq.f32.partialorder %v1763_v14, inf  ;;  %v1790_v59 = vand.u32 2147483648, %v1763_v14  ;;  %vm1789_vm5 = vcmp.eq.f32.partialorder %v1763_v14, 0.0 }
0x1064   :  { %v1767_v36 = vsel %vm1766_vm8, %v1754_v58, %v1765_v16  ;;  %vm2531_vm8 = vcmask 719872  }
0x1065   :  { %v2864_v12 = vpop.eup %2863  ;;  %v1770_v53 = vsel %vm1768_vm9, %v1769_v34, %v1767_v36  ;;  %vm2533_vm9 = vcmask 1045504  }
0x1066   :  { %v1803_v38 = vmul.f32 %v1796_v37, %v1770_v53  ;;  %v1772_v45 = vmul.f32 %v2864_v12, %v1757_v26  ;;  %v1822_v29 = vpop.permute.xlu0 %1821  ;;  %v1741_v48 = vpop.xlane.xlu1 %1740 }
0x1067   :  { %v1826_v22 = vrot.slane %v1822_v29, %v3133_v57  ;;  %v1830_v7 = vrot.slane %v1822_v29, %v3203_v39 }
0x1068   :  { %v1807_v5 = vmax.f32 %v1803_v38, 1e-08  ;;  %v1774_v54 = vsel %vm1773_vm10, %v1757_v26, %v1772_v45 }
0x1069   :  { %v2866_v55 = vpop.eup %2865  ;;  %v1777_v60 = vsel %vm1775_vm11, %v1776_v4, %v1774_v54 }
0x106a   :  { %2869 = vrcp.f32 %v1807_v5  ;;  %v1779_v62 = vmul.f32 %v2866_v55, %v1760_v56  ;;  %v1804_v43 = vmul.f32 %v1796_v37, %v1777_v60  ;;  %v1747_v16 = vpop.xlane.xlu1 %1746 }
0x106c   :  { %v1781_v23 = vsel %vm1780_vm12, %v1760_v56, %v1779_v62  ;;  %v1808_v11 = vmax.f32 %v1804_v43, 1e-08 }
0x106d   :  { %v2868_v35 = vpop.eup %2867  ;;  %v1784_v17 = vsel %vm1782_vm13, %v1783_v63, %v1781_v23 }
0x106e   :  { %v1805_v0 = vmul.f32 %v1800_v47, %v1784_v17  ;;  %v1786_v41 = vmul.f32 %v2868_v35, %v1763_v14  ;;  %2871 = vrcp.f32 %v1808_v11 }
0x1070   :  { %v1809_v27 = vmax.f32 %v1805_v0, 1e-08  ;;  %v1788_v28 = vsel %vm1787_vm4, %v1763_v14, %v1786_v41 }
0x1071   :  { %v1791_v31 = vsel %vm1789_vm5, %v1790_v59, %v1788_v28 }
0x1072   :  { %2873 = vrcp.f32 %v1809_v27  ;;  %v1806_v33 = vmul.f32 %v1800_v47, %v1791_v31 }
0x1074   :  { %v2870_v25 = vpop.eup %2869  ;;  %v1810_v20 = vmax.f32 %v1806_v33, 1e-08 }
0x1075   :  { %v1815_v6 = vmul.f32 %v2870_v25, %v1738_v42 }
0x1076   :  { %2875 = vrcp.f32 %v1810_v20 }
0x1077   :  { %v1833_v24 = vmul.f32 %v1826_v22, %v1815_v6 }
0x1078   :  { %v2872_v58 = vpop.eup %2871 }
0x1079   :  { %v1816_v50 = vmul.f32 %v2872_v58, %v1741_v48  ;;  %1842 = vperm.xlu1 %2769, %v1833_v24  }
0x107b   :  { %v1834_v26 = vmul.f32 %v1826_v22, %v1816_v50 }
0x107c   :  { %v2874_v32 = vpop.eup %2873 }
0x107d   :  { %v1817_v56 = vmul.f32 %v2874_v32, %v1744_v52  ;;  %1845 = vperm.xlu1 %2769, %v1834_v26  }
0x107f   :  { %v1835_v3 = vmul.f32 %v1830_v7, %v1817_v56 }
0x1080   :  { %v2876_v46 = vpop.eup %2875 }
0x1081   :  { %v1818_v14 = vmul.f32 %v2876_v46, %v1747_v16  ;;  %1848 = vperm.xlu0 %2768, %v1835_v3  }
0x1083   :  { %v1836_v34 = vmul.f32 %v1830_v7, %v1818_v14 }
0x1085   :  { %1851 = vperm.xlu1 %2769, %v1836_v34  }
0x10f8   :  { %v1843_v36 = vpop.permute.xlu1 %1842 }
0x10f9   :  { %v1856_v45 = vrot.slane %v1843_v36, %v3217_v18 }
0x10fc   :  { %v1846_v37 = vpop.permute.xlu1 %1845 }
0x10fd   :  { %v1860_v53 = vrot.slane %v1846_v37, %v3214_v13 }
0x10ff   :  { %v1861_v54 = vsel %vm510_vm14, %v1860_v53, %v1856_v45 }
0x1100   :  { %v1849_v12 = vpop.permute.xlu0 %1848 }
0x1101   :  { %v1865_v4 = vrot.slane %v1849_v12, %v3217_v18 }
0x1104   :  { %v1852_v38 = vpop.permute.xlu1 %1851 }
0x1105   :  { %v1869_v5 = vrot.slane %v1852_v38, %v3214_v13 }
0x1107   :  { %v1870_v55 = vsel %vm510_vm14, %v1869_v5, %v1865_v4 }
0x1108   :  { %v1871_v60 = vsel %vm521_vm15, %v1870_v55, %v1861_v54 }
0x1109   :  { %v1873_v42 = vsel %vm524_vm3, %v1871_v60, -inf }
0x110a   :  { %1874 = vmax.xlane.f32.xlu0 %v1873_v42 }
0x1197   :  { %v1875_v62 = vpop.xlane.xlu0 %1874 }
0x1198   :  { %v1880_v43 = vrot.slane %v1875_v62, %v3133_v57  ;;  %v1884_v63 = vrot.slane %v1875_v62, %v3203_v39 }
0x119a   :  { %v1887_v23 = vsub.f32 %v1833_v24, %v1880_v43  ;;  %v1888_v47 = vsub.f32 %v1834_v26, %v1880_v43  ;;  %v1889_v35 = vsub.f32 %v1835_v3, %v1884_v63  ;;  %v1890_v0 = vsub.f32 %v1836_v34, %v1884_v63 }
0x119b   :  { %v2078_v34 = vrot.slane %v2071_v40, %v3036_v8 }
0x119c   :  { %v1891_v11 = vmul.f32 1.442695, %v1887_v23  ;;  %v1893_v17 = vmul.f32 1.442695, %v1888_v47  ;;  %v1895_v52 = vmul.f32 1.442695, %v1889_v35 }
0x119d   :  { %v1897_v41 = vmul.f32 1.442695, %v1890_v0  ;;  %v2085_v36 = vrot.slane %v2078_v34, %v3036_v8 }
0x119e   :  { %2877 = vpow2.f32 %v1891_v11 }
0x119f   :  { %2879 = vpow2.f32 %v1893_v17 }
0x11a0   :  { %2881 = vpow2.f32 %v1895_v52  ;;  %v2900_v52 = vld [vmem:[%s3714_s7] ss:$0 sm:$0xff] }
0x11a1   :  { %2883 = vpow2.f32 %v1897_v41 }
0x11a8   :  { %v2878_v59 = vpop.eup %2877 }
0x11a9   :  { %1904 = vperm.xlu1 %2769, %v2878_v59   ;;  %v2880_v27 = vpop.eup %2879 }
0x11aa   :  { %v2882_v28 = vpop.eup %2881 }
0x11ab   :  { %v2884_v31 = vpop.eup %2883 }
0x11ad   :  { %1907 = vperm.xlu1 %2769, %v2880_v27  }
0x11b1   :  { %1910 = vperm.xlu1 %2769, %v2882_v28  }
0x11b5   :  { %1913 = vperm.xlu1 %2769, %v2884_v31  }
0x1228   :  { %v1905_v29 = vpop.permute.xlu1 %1904 }
0x1229   :  { %v1918_v22 = vrot.slane %v1905_v29, %v3217_v18 }
0x122c   :  { %v1908_v33 = vpop.permute.xlu1 %1907 }
0x122d   :  { %v1922_v20 = vrot.slane %v1908_v33, %v3214_v13 }
0x122f   :  { %v1923_v48 = vsel %vm510_vm14, %v1922_v20, %v1918_v22 }
0x1230   :  { %v1911_v25 = vpop.permute.xlu1 %1910 }
0x1231   :  { %v1927_v24 = vrot.slane %v1911_v25, %v3217_v18  ;;  %v2112_v25 = vcombine.low %v3495_v15, %v3491_v21  ;;  %v2277_v21 = vld [vmem:[#allocation3 + $0x10] sm:$0xff] }
0x1233   :  { %v2119_v20 = vrot.slane %v2112_v25, %v3036_v8  ;;  %v2557_v25 = vld [vmem:[%s3718_s11] ss:$0 sm:$0xff] }
0x1234   :  { %v1914_v6 = vpop.permute.xlu1 %1913 }
0x1235   :  { %v1931_v58 = vrot.slane %v1914_v6, %v3214_v13 }
0x1237   :  { %v1932_v50 = vsel %vm510_vm14, %v1931_v58, %v1927_v24  ;;  %v2126_v58 = vrot.slane %v2119_v20, %v3036_v8  ;;  %vm2416_vm14 = vcmask 523264  }
0x1238   :  { %v1933_v26 = vsel %vm521_vm15, %v1932_v50, %v1923_v48 }
0x1239   :  { %v1935_v32 = vsel %vm524_vm3, %v1933_v26, 0.0  ;;  %vm2523_vm3 = vcmask 269312  }
0x123a   :  { %1936 = vadd.xlane.f32.xlu1 %v1935_v32  ;;  %v2275_v32 = vld [vmem:[#allocation3] sm:$0xff] }
0x12c7   :  { %v1937_v56 = vpop.xlane.xlu1 %1936 }
0x12c8   :  { %2885 = vrcp.f32 %v1937_v56  ;;  %v2276_v56 = vld [vmem:[#allocation3 + $0x8] sm:$0xff] }
0x12c9   :  { %v2740_v15 = vpack.c.bf16 %v2276_v56, %v2275_v32 }
0x12cb   :  { %2741 = vmatpush3.bf16.msra.mxu0 %v2740_v15 }
0x12cc   :  { %2742 = vmatprep.subr.bf16.mxu0 %v2928_v1 }
0x12d2   :  { %v2886_v7 = vpop.eup %2885 }
0x12d3   :  { %v1947_v3 = vrot.slane %v2886_v7, %v3203_v39  ;;  %v1943_v46 = vrot.slane %v2886_v7, %v3133_v57  ;;  %v2278_v7 = vld [vmem:[#allocation3 + $0x18] sm:$0xff] }
0x12d5   :  { %v1952_v16 = vmul.f32 %v2882_v28, %v1947_v3  ;;  %v1950_v18 = vmul.f32 %v2878_v59, %v1943_v46  ;;  %v1951_v13 = vmul.f32 %v2880_v27, %v1943_v46  ;;  %v1953_v14 = vmul.f32 %v2884_v31, %v1947_v3 }
0x12d6   :  { %v2743_v3 = vpack.c.bf16 %v2278_v7, %v2277_v21 }
0x12d7   :  { %1966 = vperm.xlu1 %2769, %v1952_v16   ;;  %1956 = vperm.xlu0 %2768, %v1950_v18  }
0x12d8   :  { %2744 = vmatpush3.bf16.msra.mxu0 %v2743_v3 }
0x12db   :  { %1961 = vperm.xlu0 %2768, %v1951_v13  }
0x12df   :  { %1971 = vperm.xlu0 %2768, %v1953_v14  }
0x12e3   :  { %2086 = vrot.lane.b32.xlu0 %v2085_v36, %s2933_s3 }
0x12e7   :  { %2096 = vrot.lane.b32.xlu0 %v2085_v36, %s2934_s10 }
0x1356   :  { %v1957_v39 = vpop.permute.xlu0 %1956  ;;  %v1967_v12 = vpop.permute.xlu1 %1966 }
0x1357   :  { %v1974_v37 = vmul.f32 %v1957_v39, %v3553_v61  ;;  %v1976_v45 = vmul.f32 %v1967_v12, %v3569_v44 }
0x1359   :  { %v1978_v4 = vsel %vm79_vm1, %v1974_v37, 0.0  ;;  %v1987_v55 = vsel %vm79_vm1, %v1976_v45, 0.0 }
0x135a   :  { %v1962_v53 = vpop.permute.xlu0 %1961 }
0x135b   :  { %v1975_v38 = vmul.f32 %v1962_v53, %v3562_v51 }
0x135d   :  { %v1979_v9 = vsel %vm79_vm1, %v1975_v38, 0.0 }
0x135e   :  { %v1980_v10 = vadd.f32 %v1979_v9, %v1978_v4  ;;  %v1972_v40 = vpop.permute.xlu0 %1971 }
0x135f   :  { %v1977_v5 = vmul.f32 %v1972_v40, %v3578_v19 }
0x1360   :  { %v1981_v54 = vrot.slane %v1980_v10, 4 }
0x1361   :  { %v1988_v60 = vsel %vm79_vm1, %v1977_v5, 0.0 }
0x1362   :  { %v1982_v61 = vadd.f32 %v1981_v54, %v1980_v10  ;;  %v1989_v42 = vadd.f32 %v1988_v60, %v1987_v55  ;;  %v2087_v27 = vpop.permute.xlu0 %2086  ;;  %v2401_v54 = vld [vmem:[%s3719_s12] sm:$0xff]  ;;  %v2402_v55 = vld [vmem:[%s3719_s12 + $0x8] sm:$0xff] }
0x1364   :  { %v1983_v62 = vrot.slane %v1982_v61, 2  ;;  %v1990_v43 = vrot.slane %v1989_v42, 4 }
0x1366   :  { %v1984_v51 = vadd.f32 %v1983_v62, %v1982_v61  ;;  %v1991_v63 = vadd.f32 %v1990_v43, %v1989_v42  ;;  %v2097_v22 = vpop.permute.xlu0 %2096  ;;  %v2404_v42 = vld [vmem:[%s3719_s12 + $0x18] sm:$0xff]  ;;  %v2746_v62 = vpack.c.bf16 %v2402_v55, %v2401_v54 }
0x1368   :  { %v1992_v44 = vrot.slane %v1991_v63, 2  ;;  %v1985_v23 = vrot.slane %v1984_v51, 1 }
0x136a   :  { %v1993_v47 = vadd.f32 %v1992_v44, %v1991_v63  ;;  %v1986_v35 = vadd.f32 %v1985_v23, %v1984_v51 }
0x136c   :  { %v1994_v11 = vrot.slane %v1993_v47, 1 }
0x136e   :  { %v1995_v17 = vadd.f32 %v1994_v11, %v1993_v47 }
0x1370   :  { %v1998_v0 = vsel %vm521_vm15, %v1995_v17, %v1986_v35  ;;  %v2405_v17 = vld [vmem:[%s3719_s12 + $0x20] sm:$0xff] }
0x1371   :  { %2671 = vmatmul.mubr.msk.f32.vlgmr.msra.gmra.mrb[4].mxu1 %vm79_vm1, %v1998_v0  ;;  %v2406_v0 = vld [vmem:[%s3719_s12 + $0x28] sm:$0xff] }
0x1372   :  { %2700 = vmatprep.mubr.msk.f32.mxu1 %vm2929_vm0, %v2930_v2  ;;  %vm2224_vm0 = vcmask 1041408   ;;  %2747 = vmatpush3.bf16.msra.mxu1 %v2746_v62 }
0x1373   :  { %2748 = vmatprep.subr.bf16.mxu1 %v2928_v1 }
0x1444   :  { %v2067_v19 = vpop.f32.mrb[4].mxu1 }
0x1445   :  { %v2068_v41 = vadd.f32 %v2900_v52, %v2067_v19  ;;  %v2672_v59 = vpop.f32.mrb[5].mxu1 }
0x1447   :  { %v2089_v28 = vadd.f32 %v2087_v27, %v2068_v41 }
0x1449   :  { %v2556_v31 = vmul.f32 -1.442695, %v2089_v28 }
0x144b   :  { %2887 = vpow2.f32 %v2556_v31 }
0x1455   :  { %v2888_v29 = vpop.eup %2887 }
0x1456   :  { %v2093_v33 = vadd.f32 1.0, %v2888_v29  ;;  %v2407_v29 = vld [vmem:[%s3719_s12 + $0x30] sm:$0xff] }
0x1458   :  { %2889 = vrcp.f32 %v2093_v33  ;;  %v2408_v33 = vld [vmem:[%s3719_s12 + $0x38] sm:$0xff] }
0x1462   :  { %v2890_v6 = vpop.eup %2889 }
0x1463   :  { %v2099_v24 = vmul.f32 %v2890_v6, %v2097_v22  ;;  %v2106_v16 = vsub.f32 1.0, %v2890_v6 }
0x1465   :  { %2101 = vrot.lane.b32.xlu0 %v2099_v24, %s2935_s21  ;;  %v2559_v24 = vld [vmem:[%s3720_s13] ss:$0 sm:$0xff] }
0x1469   :  { %2127 = vrot.lane.b32.xlu0 %v2126_v58, %s2934_s10 }
0x14d7   :  { %v2102_v48 = vpop.permute.xlu0 %2101 }
0x14d8   :  { %v2104_v50 = vadd.f32 %v2102_v48, %v2068_v41  ;;  %v2752_v41 = vpack.c.bf16 %v2406_v0, %v2405_v17 }
0x14da   :  { %2891 = vtanh.f32 %v2104_v50 }
0x14db   :  { %v2128_v46 = vpop.permute.xlu0 %2127 }
0x14dc   :  { %v2130_v13 = vmul.f32 %v2890_v6, %v2128_v46 }
0x14e4   :  { %v2892_v26 = vpop.eup %2891 }
0x14e5   :  { %2108 = vrot.lane.b32.xlu1 %v2892_v26, %s2933_s3 }
0x1557   :  { %v2109_v18 = vpop.permute.xlu1 %2108 }
0x1558   :  { %v2111_v14 = vmul.f32 %v2109_v18, %v2106_v16 }
0x155a   :  { %v2131_v34 = vadd.f32 %v2130_v13, %v2111_v14 }
0x155c   :  { %v2185_v36 = vrot.slane %v2131_v34, %v3036_v8 }
0x155e   :  { %v2186_v39 = vcombine.high %v2185_v36, %v2185_v36  ;;  %v2193_v37 = vrot.slane %v2185_v36, %v3036_v8 }
0x1560   :  { %v2200_v12 = vrot.slane %v2186_v39, %v3036_v8  ;;  %v2214_v53 = vrot.slane %v2193_v37, %v3133_v57 }
0x1562   :  { %v2218_v38 = vrot.slane %v2200_v12, %v3133_v57  ;;  %v2225_v45 = vsel %vm2224_vm0, %v3514_v30, %v2214_v53 }
0x1563   :  { %v2235_v4 = vrot.slane %v2225_v45, %v3036_v8 }
0x1564   :  { %v2226_v9 = vsel %vm2224_vm0, %v3516_v49, %v2218_v38  ;;  %v2403_v49 = vld [vmem:[%s3719_s12 + $0x10] sm:$0xff] }
0x1565   :  { %v2236_v10 = vcombine.high %v2235_v4, %v2235_v4  ;;  %v2243_v40 = vrot.slane %v2235_v4, %v3036_v8  ;;  %v2258_v5 = vrot.slane %v2226_v9, %v3036_v8  ;;  %v2749_v23 = vpack.c.bf16 %v2404_v42, %v2403_v49 }
0x1567   :  { %v2250_v57 = vrot.slane %v2236_v10, %v3036_v8  ;;  %v2251_v30 = vcombine.high %v2243_v40, %v2243_v40  ;;  %v2259_v60 = vcombine.high %v2258_v5, %v2258_v5  ;;  %v2266_v61 = vrot.slane %v2258_v5, %v3036_v8  ;;  %2750 = vmatpush3.bf16.msra.mxu1 %v2749_v23 }
0x1568   :  { %2751 = vmatprep.subr.bf16.mxu1 %v2928_v1 }
0x1569   :  { %v2273_v43 = vrot.slane %v2259_v60, %v3036_v8  ;;  %v2274_v51 = vcombine.high %v2266_v61, %v2266_v61  ;;  %v2286_v63 = vcombine.low %v2243_v40, %v2250_v57  ;;  %v2287_v44 = vcombine.low %v2251_v30, %v2266_v61 }
0x156b   :  { %v2288_v47 = vcombine.low %v2273_v43, %v2274_v51  ;;  %v2295_v11 = vrot.slane %v2286_v63, %v3036_v8  ;;  %v2302_v35 = vrot.slane %v2287_v44, %v3036_v8  ;;  %2753 = vmatpush3.bf16.msra.mxu1 %v2752_v41 }
0x156c   :  { %2754 = vmatprep.subr.bf16.mxu1 %v2928_v1 }
0x156d   :  { %v2309_v19 = vrot.slane %v2288_v47, %v3036_v8  ;;  %v2310_v52 = vcombine.low %v2295_v11, %v2302_v35 }
0x156f   :  { %v2317_v59 = vrot.slane %v2310_v52, %v3036_v8  ;;  %v2324_v27 = vrot.slane %v2309_v19, %v3036_v8  ;;  %v2755_v8 = vpack.c.bf16 %v2408_v33, %v2407_v29 }
0x1571   :  { %v2325_v28 = vcombine.low %v2317_v59, %v2324_v27  ;;  %2756 = vmatpush3.bf16.msra.mxu1 %v2755_v8 }
0x1573   :  { %2326 = vrot.lane.b32.xlu1 %v2325_v28, %s2933_s3 }
0x15e5   :  { %v2327_v31 = vpop.permute.xlu1 %2326 }
0x15e6   :  { %2682 = vmatmul.mubr.msk.f32.vlgmr.msra.gmra.mrb[6].mxu0 %vm79_vm1, %v2327_v31 }
0x16b9   :  { %v2396_v20 = vpop.f32.mrb[6].mxu0 }
0x16ba   :  { %v2397_v6 = vadd.f32 %v2557_v25, %v2396_v20  ;;  %v2683_v1 = vpop.f32.mrb[7].mxu0 }
0x16bc   :  { %v2400_v22 = vmax.f32 %v2397_v6, 0.0 }
0x16be   :  { %2701 = vmatmul.mubr.msk.f32.vlgmr.msra.gmra.mrb[6].mxu1 %vm2416_vm14, %v2400_v22 }
0x1791   :  { %v2486_v58 = vpop.f32.mrb[6].mxu1 }
0x1792   :  { %v2487_v48 = vadd.f32 %v2559_v24, %v2486_v58  ;;  %v2702_v50 = vpop.f32.mrb[7].mxu1 }
0x1794   :  { %2893 = vtanh.f32 %v2487_v48  ;;  %v2562_v26 = vmul.f32 -1.442695, %v2487_v48  ;;  %2507 = vrot.lane.b32.xlu1 %v2487_v48, %s2934_s10  ;;  %vm2492_vm15 = vcmp.gt.f32.partialorder %v2487_v48, 0.0 }
0x1795   :  { %v2561_v32 = vsel %vm2492_vm15, 1.0, %v2930_v2 }
0x1796   :  { %2895 = vpow2.f32 %v2562_v26 }
0x1798   :  { %2515 = vrot.lane.b32.xlu1 %v2561_v32, %s2934_s10 }
0x179e   :  { %v2894_v56 = vpop.eup %2893 }
0x179f   :  { %2511 = vrot.lane.b32.xlu0 %v2894_v56, %s2934_s10  ;;  %v2491_v7 = vand.u32 2147483647, %v2894_v56 }
0x17a0   :  { %v2896_v21 = vpop.eup %2895 }
0x17a1   :  { %v2498_v15 = vadd.f32 1.0, %v2896_v21 }
0x17a3   :  { %2897 = vrcp.f32 %v2498_v15  ;;  %2503 = vrot.lane.b32.xlu0 %v2491_v7, %s2934_s10 }
0x17ad   :  { %v2898_v3 = vpop.eup %2897 }
0x17ae   :  { %2519 = vrot.lane.b32.xlu0 %v2898_v3, %s2934_s10 }
0x1806   :  { %v2508_v2 = vpop.permute.xlu1 %2507 }
0x180a   :  { %v2516_v34 = vpop.permute.xlu1 %2515 }
0x1811   :  { %v2512_v46 = vpop.permute.xlu0 %2511 }
0x1815   :  { %v2504_v16 = vpop.permute.xlu0 %2503 }
0x1816   :  { %v2522_v18 = vsel %vm79_vm1, %v2327_v31, %v2504_v16 }
0x1817   :  { %v2524_v13 = vsel %vm2523_vm3, %v2522_v18, %v2508_v2 }
0x1818   :  { %v2526_v14 = vsel %vm2525_vm2, %v2524_v13, %v2512_v46 }
0x1819   :  { %v2528_v36 = vsel %vm2527_vm6, %v2526_v14, %v2516_v34 }
0x1820   :  { %v2520_v39 = vpop.permute.xlu0 %2519 }
0x1821   :  { %v2530_v37 = vsel %vm2529_vm7, %v2528_v36, %v2520_v39 }
0x1822   :  { %v2532_v12 = vsel %vm2531_vm8, %v2530_v37, 0.0 }
0x1823   :  { %v2534_v53 = vsel %vm2533_vm9, %v2532_v12, 0.0 }
0x1824   :  { %2535 = vst [vmem:[%s3721_s14] sm:$0xff] %v2534_v53 }
0x1825   :  { %2540 = vsyncpa [#allocation4], 1 }

</bundles_post_ra>
